<compile_context>
chip_gen: v6e
topology: v6e:2x2x1
jax: 0.10.0
libtpu: 0.0.40
codegen_flags: <defaults>
</compile_context>

<pallas_src>
import functools

import jax
import jax.numpy as jnp
import numpy as np
from jax import lax
from jax.experimental import pallas as pl
from jax.experimental.pallas import tpu as pltpu

CP = 128  # lane-dense padded node-feature width


def _round_up(x, m):
    return ((x + m - 1) // m) * m


def _monet_fused_kernel(n_layers, n_edge_tiles,
                        feat_ref, pseudo_ref, src_ref, dst_ref,
                        Wp_ref, bp_ref, Wg_ref, Mg_ref, cg_ref,
                        Wfc_ref, bias_ref, B_ref, R_ref,
                        out_ref,
                        h_ref, hfc_ref, acc_ref):
    f32 = jnp.float32
    bf16 = jnp.bfloat16
    l = pl.program_id(0)
    et = pl.program_id(1)
    Np = h_ref.shape[0]
    TE = pseudo_ref.shape[0]

    # ---- layer prologue -------------------------------------------------
    @pl.when((l == 0) & (et == 0))
    def _():
        h_ref[...] = feat_ref[...]                     # load input features once

    @pl.when(et == 0)
    def _():
        # per-layer node fc in bf16 (f32 accumulate): (Np,CP)@(CP,KCP)
        hfc_ref[...] = jnp.dot(h_ref[...].astype(bf16), Wfc_ref[0],
                               preferred_element_type=f32).astype(bf16)
        acc_ref[...] = jnp.zeros_like(acc_ref)         # reset scatter accumulator

    # ---- per edge-tile work ---------------------------------------------
    # pseudo projection: tanh(pseudo @ Wp + bp)                      (TE, dim)
    u = jnp.tanh(jnp.dot(pseudo_ref[...], Wp_ref[0],
                         preferred_element_type=f32) + bp_ref[0])
    # gaussian kernel weights via expanded quadratic form            (TE, K)
    A = jnp.dot(u * u, Wg_ref[0], preferred_element_type=f32)
    Bq = jnp.dot(u, Mg_ref[0], preferred_element_type=f32)
    expo = -0.5 * (A - 2.0 * Bq + cg_ref[0])
    w = jnp.exp(jnp.minimum(expo, 0.0))                # clamp: w <= 1, no overflow

    # broadcast each kernel weight across its cout-wide channel block (MXU)
    w_rep = jnp.dot(w, B_ref[0], preferred_element_type=f32)        # (TE, KCP)

    # gather one-hot built on-chip from src indices (padded edges -> all-zero row)
    src_eq = src_ref[...] == lax.broadcasted_iota(jnp.int32, (TE, Np), 1)
    S_t = jnp.where(src_eq, 1.0, 0.0).astype(bf16)                  # (TE, Np)
    h_src = jnp.dot(S_t, hfc_ref[...], preferred_element_type=f32)  # (TE, KCP)

    # kernel-weighted message, folded over K with one (f32) matmul   (TE, CP)
    msg_f = jnp.dot(w_rep * h_src, R_ref[0], preferred_element_type=f32)

    # scatter one-hot built on-chip from dst indices; bf16 MXU, f32 accumulate
    dst_eq = lax.broadcasted_iota(jnp.int32, (Np, TE), 0) == dst_ref[...]
    DT_t = jnp.where(dst_eq, 1.0, 0.0).astype(bf16)                 # (Np, TE)
    acc_ref[...] += jnp.dot(DT_t, msg_f.astype(bf16),
                            preferred_element_type=f32)             # (Np, CP)

    # ---- layer epilogue ---------------------------------------------------
    @pl.when(et == n_edge_tiles - 1)
    def _():
        h_ref[...] = acc_ref[...] + bias_ref[0]

    @pl.when((et == n_edge_tiles - 1) & (l == n_layers - 1))
    def _():
        out_ref[...] = h_ref[...]


# ---------------- one-time parameter packing (hoisted out of the forward) ----
def pack_monet_params(params, n_kernels, cp=CP):
    K = n_kernels
    dim = params[0][3].shape[1]                         # mu: (K, dim)
    max_cout = max(p[-1].shape[-1] for p in params)
    kcp = _round_up(K * max_cout, 128)                  # K-dense packed width
    Wp_l, bp_l, Wg_l, Mg_l, cg_l = [], [], [], [], []
    Wfc_l, bias_l, B_l, R_l = [], [], [], []
    for (Wp, bp, Wfc, mu, inv_sigma, bias) in params:
        cin = Wfc.shape[0]
        cout = bias.shape[-1]
        s2 = inv_sigma * inv_sigma
        Wg_l.append(jnp.transpose(s2))                              # (dim, K)
        Mg_l.append(jnp.transpose(mu * s2))                         # (dim, K)
        cg_l.append(jnp.sum(mu * mu * s2, axis=1)[None, :])         # (1, K)
        Wp_l.append(Wp)
        bp_l.append(bp)
        # K-dense fc weight: col (k*cout + f), padded once to kcp; stored bf16
        Wfc_p = jnp.zeros((cp, kcp), jnp.float32).at[:cin, :K * cout].set(Wfc)
        Wfc_l.append(Wfc_p.astype(jnp.bfloat16))
        bias_l.append(jnp.zeros((1, cp), jnp.float32).at[:, :cout].set(bias))
        # block-broadcast matrix (K, kcp): w[:,k] -> cols [k*cout, (k+1)*cout)
        Bm = jnp.kron(jnp.eye(K, dtype=jnp.float32),
                      jnp.ones((1, cout), jnp.float32))             # (K, K*cout)
        B_l.append(jnp.zeros((K, kcp), jnp.float32).at[:, :K * cout].set(Bm))
        # K-fold matrix (kcp, cp): sums the K channel blocks
        Rm = jnp.kron(jnp.ones((K, 1), jnp.float32),
                      jnp.eye(cout, dtype=jnp.float32))             # (K*cout, cout)
        R_l.append(jnp.zeros((kcp, cp), jnp.float32).at[:K * cout, :cout].set(Rm))
    return dict(
        Wp=jnp.stack(Wp_l), bp=jnp.stack(bp_l),
        Wg=jnp.stack(Wg_l), Mg=jnp.stack(Mg_l), cg=jnp.stack(cg_l),
        Wfc=jnp.stack(Wfc_l), bias=jnp.stack(bias_l),
        B=jnp.stack(B_l), R=jnp.stack(R_l),
        n_layers=len(params), n_kernels=K, dim=dim, cp=cp, kcp=kcp,
        out_feats=params[-1][-1].shape[-1],
    )


def prepare_graph(feat, pseudo, src, dst, num_nodes, cp=CP, edge_tile=256):
    """Pad graph to tile multiples; edges carried as small int32 index vectors."""
    E = pseudo.shape[0]
    N = num_nodes
    Np = max(128, _round_up(N, 128))       # lane/sublane-dense node padding
    Ep = _round_up(E, edge_tile)
    feat_p = jnp.zeros((Np, cp), jnp.float32).at[:N, :feat.shape[1]].set(feat)
    pseudo_p = jnp.zeros((Ep, pseudo.shape[1]), jnp.float32).at[:E].set(pseudo)
    pad_id = jnp.int32(Np)                 # invalid node id -> padded edges are no-ops
    src_p = jnp.full((Ep, 1), pad_id, jnp.int32).at[:E, 0].set(src.astype(jnp.int32))
    dst_p = jnp.full((1, Ep), pad_id, jnp.int32).at[0, :E].set(dst.astype(jnp.int32))
    return feat_p, pseudo_p, src_p, dst_p, Np, Ep


def monet_forward(feat_p, pseudo_p, src_p, dst_p, packed, edge_tile=256):
    L, K = packed["n_layers"], packed["n_kernels"]
    dim, cp, kcp = packed["dim"], packed["cp"], packed["kcp"]
    Np = feat_p.shape[0]
    Ep = pseudo_p.shape[0]
    pdim = pseudo_p.shape[1]
    TE = edge_tile
    n_et = Ep // TE

    kern = functools.partial(_monet_fused_kernel, L, n_et)
    in_specs = [
        pl.BlockSpec((Np, cp), lambda l, et: (0, 0)),        # feat (resident)
        pl.BlockSpec((TE, pdim), lambda l, et: (et, 0)),     # pseudo tile
        pl.BlockSpec((TE, 1), lambda l, et: (et, 0)),        # src ids tile
        pl.BlockSpec((1, TE), lambda l, et: (0, et)),        # dst ids tile
        pl.BlockSpec((1, 2, dim), lambda l, et: (l, 0, 0)),  # Wp
        pl.BlockSpec((1, 1, dim), lambda l, et: (l, 0, 0)),  # bp
        pl.BlockSpec((1, dim, K), lambda l, et: (l, 0, 0)),  # Wg
        pl.BlockSpec((1, dim, K), lambda l, et: (l, 0, 0)),  # Mg
        pl.BlockSpec((1, 1, K), lambda l, et: (l, 0, 0)),    # cg
        pl.BlockSpec((1, cp, kcp), lambda l, et: (l, 0, 0)), # Wfc (bf16)
        pl.BlockSpec((1, 1, cp), lambda l, et: (l, 0, 0)),   # bias
        pl.BlockSpec((1, K, kcp), lambda l, et: (l, 0, 0)),  # B (block-broadcast)
        pl.BlockSpec((1, kcp, cp), lambda l, et: (l, 0, 0)), # R (K-fold)
    ]
    out_specs = pl.BlockSpec((Np, cp), lambda l, et: (0, 0))

    return pl.pallas_call(
        kern,
        out_shape=jax.ShapeDtypeStruct((Np, cp), jnp.float32),
        grid=(L, n_et),
        in_specs=in_specs,
        out_specs=out_specs,
        scratch_shapes=[
            pltpu.VMEM((Np, cp), jnp.float32),    # h: node features, carried across layers
            pltpu.VMEM((Np, kcp), jnp.bfloat16),  # h @ Wfc, computed once per layer
            pltpu.VMEM((Np, cp), jnp.float32),    # scatter-add accumulator
        ],
        compiler_params=pltpu.CompilerParams(
            dimension_semantics=("arbitrary", "arbitrary"),
            vmem_limit_bytes=64 * 1024 * 1024),
    )(feat_p, pseudo_p, src_p, dst_p,
      packed["Wp"], packed["bp"], packed["Wg"], packed["Mg"], packed["cg"],
      packed["Wfc"], packed["bias"], packed["B"], packed["R"])


def init_monet_params(key, in_feats, n_hidden, out_feats, n_layers, dim, n_kernels):
    io = [(in_feats, n_hidden)] + [(n_hidden, n_hidden)] * (n_layers - 1) \
         + [(n_hidden, out_feats)]
    params = []
    for (cin, cout) in io:
        key, k1, k2, k3, k4, k5 = jax.random.split(key, 6)
        Wp = jax.random.normal(k1, (2, dim), jnp.float32) * 0.5
        bp = jax.random.normal(k2, (1, dim), jnp.float32) * 0.1
        Wfc = jax.random.normal(k3, (cin, n_kernels * cout), jnp.float32) \
              * (1.0 / np.sqrt(cin))
        mu = jax.random.normal(k4, (n_kernels, dim), jnp.float32)
        inv_sigma = 1.0 + 0.1 * jax.random.normal(k5, (n_kernels, dim), jnp.float32)
        bias = jnp.zeros((1, cout), jnp.float32)
        params.append((Wp, bp, Wfc, mu, inv_sigma, bias))
    return params


# ---------------- plain-JAX reference (sanity check only) --------------------
def _gmm_layer_ref(feat, pseudo, src, dst, params, num_nodes):
    Wp, bp, Wfc, mu, inv_sigma, bias = params
    u = jnp.tanh(pseudo @ Wp + bp)
    diff = u[:, None, :] - mu[None, :, :]
    w = jnp.exp(-0.5 * jnp.sum((diff * inv_sigma[None]) ** 2, axis=-1))
    K, _ = mu.shape
    F = bias.shape[-1]
    h = (feat @ Wfc).reshape(-1, K, F)
    msg = jnp.einsum('ek,ekf->ef', w, h[src])
    return jax.ops.segment_sum(msg, dst, num_segments=num_nodes) + bias


def _monet_ref(feat, pseudo, src, dst, all_params, num_nodes):
    h = feat
    for p in all_params:
        h = _gmm_layer_ref(h, pseudo, src, dst, p, num_nodes)
    return h


if __name__ == "__main__":
    # small synthetic graph / model sizes
    N, E = 32, 200                        # nodes, edges (padded to 256 -> 1 edge tile)
    in_feats, n_hidden, out_feats = 16, 32, 8
    n_layers, dim, n_kernels = 2, 4, 3    # -> 3 GMMConv layers total

    key = jax.random.PRNGKey(0)
    key, kf, kp, ks, kd = jax.random.split(key, 5)
    feat = jax.random.normal(kf, (N, in_feats), jnp.float32)
    pseudo = jax.random.normal(kp, (E, 2), jnp.float32)
    src = jax.random.randint(ks, (E,), 0, N)
    dst = jax.random.randint(kd, (E,), 0, N)

    params = init_monet_params(key, in_feats, n_hidden, out_feats,
                               n_layers, dim, n_kernels)
    packed = pack_monet_params(params, n_kernels)
    feat_p, pseudo_p, src_p, dst_p, Np, Ep = prepare_graph(
        feat, pseudo, src, dst, N, edge_tile=256)

    out_pad = monet_forward(feat_p, pseudo_p, src_p, dst_p, packed, edge_tile=256)
    out_pad = jax.block_until_ready(out_pad)
    out = np.asarray(out_pad)[:N, :out_feats]
    assert out.shape == (N, out_feats)

    ref = np.asarray(jax.block_until_ready(
        _monet_ref(feat, pseudo, src, dst, params, N)))
    # bf16-MXU kernel vs f32 reference: relative max-norm error check
    rel_err = np.max(np.abs(out - ref)) / (np.max(np.abs(ref)) + 1e-12)
    assert rel_err < 5e-2, f"Pallas output mismatch vs reference (rel_err={rel_err})"

    print("KERNEL_OK")
</pallas_src>

<mosaic_0001>
module attributes {stable_mosaic.version = 11 : i64} {
  func.func @_monet_fused_kernel(%arg0: i32, %arg1: i32, %arg2: memref<128x128xf32, #tpu.memory_space<vmem>>, %arg3: memref<256x2xf32, #tpu.memory_space<vmem>>, %arg4: memref<256x1xi32, #tpu.memory_space<vmem>>, %arg5: memref<1x256xi32, #tpu.memory_space<vmem>>, %arg6: memref<1x2x4xf32, #tpu.memory_space<vmem>>, %arg7: memref<1x1x4xf32, #tpu.memory_space<vmem>>, %arg8: memref<1x4x3xf32, #tpu.memory_space<vmem>>, %arg9: memref<1x4x3xf32, #tpu.memory_space<vmem>>, %arg10: memref<1x1x3xf32, #tpu.memory_space<vmem>>, %arg11: memref<1x128x128xbf16, #tpu.memory_space<vmem>>, %arg12: memref<1x1x128xf32, #tpu.memory_space<vmem>>, %arg13: memref<1x3x128xf32, #tpu.memory_space<vmem>>, %arg14: memref<1x128x128xf32, #tpu.memory_space<vmem>>, %arg15: memref<128x128xf32, #tpu.memory_space<vmem>>, %arg16: memref<128x128xf32, #tpu.memory_space<vmem>>, %arg17: memref<128x128xbf16, #tpu.memory_space<vmem>>, %arg18: memref<128x128xf32, #tpu.memory_space<vmem>>) attributes {dimension_semantics = [#tpu.dimension_semantics<arbitrary>, #tpu.dimension_semantics<arbitrary>], iteration_bounds = array<i64: 3, 1>, scalar_prefetch = 0 : i64, scratch_operands = 3 : i64, tpu.core_type = #tpu.core_type<tc>, window_params = [{pipeline_mode = #tpu.pipeline_mode<synchronous>, transform_indices = @transform_0, window_bounds = array<i64: 128, 128>}, {transform_indices = @transform_1, window_bounds = array<i64: 256, 2>}, {transform_indices = @transform_2, window_bounds = array<i64: 256, 1>}, {transform_indices = @transform_3, window_bounds = array<i64: 1, 256>}, {transform_indices = @transform_4, window_bounds = array<i64: 1, 2, 4>}, {transform_indices = @transform_5, window_bounds = array<i64: 1, 1, 4>}, {transform_indices = @transform_6, window_bounds = array<i64: 1, 4, 3>}, {transform_indices = @transform_7, window_bounds = array<i64: 1, 4, 3>}, {transform_indices = @transform_8, window_bounds = array<i64: 1, 1, 3>}, {transform_indices = @transform_9, window_bounds = array<i64: 1, 128, 128>}, {transform_indices = @transform_10, window_bounds = array<i64: 1, 1, 128>}, {transform_indices = @transform_11, window_bounds = array<i64: 1, 3, 128>}, {transform_indices = @transform_12, window_bounds = array<i64: 1, 128, 128>}, {pipeline_mode = #tpu.pipeline_mode<synchronous>, transform_indices = @transform_13, window_bounds = array<i64: 128, 128>}]} {
    %c0_i32 = arith.constant 0 : i32
    %0 = arith.cmpi eq, %arg0, %c0_i32 : i32
    %c0_i32_0 = arith.constant 0 : i32
    %1 = arith.cmpi eq, %arg1, %c0_i32_0 : i32
    %2 = arith.andi %0, %1 : i1
    %3 = arith.extui %2 : i1 to i32
    %c0_i32_1 = arith.constant 0 : i32
    %4 = arith.cmpi ne, %3, %c0_i32_1 : i32
    scf.if %4 {
      %c0_53 = arith.constant 0 : index
      %c0_54 = arith.constant 0 : index
      %74 = vector.load %arg2[%c0_53, %c0_54] : memref<128x128xf32, #tpu.memory_space<vmem>>, vector<128x128xf32>
      %c0_55 = arith.constant 0 : index
      %c0_56 = arith.constant 0 : index
      %75 = vector.load %arg16[%c0_55, %c0_56] : memref<128x128xf32, #tpu.memory_space<vmem>>, vector<128x128xf32>
      tpu.vector_store %arg16[%c0_55, %c0_56], %74 {strides = array<i32>} : memref<128x128xf32, #tpu.memory_space<vmem>>, vector<128x128xf32>,
    } else {
    }
    %c0_i32_2 = arith.constant 0 : i32
    %5 = arith.cmpi eq, %arg1, %c0_i32_2 : i32
    %6 = arith.extui %5 : i1 to i32
    %c0_i32_3 = arith.constant 0 : i32
    %7 = arith.cmpi ne, %6, %c0_i32_3 : i32
    scf.if %7 {
      %c0_53 = arith.constant 0 : index
      %c0_54 = arith.constant 0 : index
      %74 = vector.load %arg16[%c0_53, %c0_54] : memref<128x128xf32, #tpu.memory_space<vmem>>, vector<128x128xf32>
      %75 = arith.truncf %74 : vector<128x128xf32> to vector<128x128xbf16>
      %c0_55 = arith.constant 0 : index
      %c0_56 = arith.constant 0 : index
      %c0_57 = arith.constant 0 : index
      %76 = vector.load %arg11[%c0_55, %c0_56, %c0_57] : memref<1x128x128xbf16, #tpu.memory_space<vmem>>, vector<1x128x128xbf16>
      %77 = vector.shape_cast %76 : vector<1x128x128xbf16> to vector<128x128xbf16>
      %cst_58 = arith.constant dense<0.000000e+00> : vector<128x128xf32>
      %78 = tpu.matmul %75, %77, %cst_58 {dimension_numbers = #tpu.dot_dimension_numbers<[1], [0], [0], [1], [0, 0, 1, 1], [], []>} : vector<128x128xbf16>, vector<128x128xbf16>, vector<128x128xf32> -> vector<128x128xf32>
      %79 = arith.truncf %78 : vector<128x128xf32> to vector<128x128xbf16>
      %c0_59 = arith.constant 0 : index
      %c0_60 = arith.constant 0 : index
      %80 = vector.load %arg17[%c0_59, %c0_60] : memref<128x128xbf16, #tpu.memory_space<vmem>>, vector<128x128xbf16>
      tpu.vector_store %arg17[%c0_59, %c0_60], %79 {strides = array<i32>} : memref<128x128xbf16, #tpu.memory_space<vmem>>, vector<128x128xbf16>,
      %cst_61 = arith.constant 0.000000e+00 : f32
      %81 = vector.broadcast %cst_61 : f32 to vector<128x128xf32>
      %c0_62 = arith.constant 0 : index
      %c0_63 = arith.constant 0 : index
      %82 = vector.load %arg18[%c0_62, %c0_63] : memref<128x128xf32, #tpu.memory_space<vmem>>, vector<128x128xf32>
      tpu.vector_store %arg18[%c0_62, %c0_63], %81 {strides = array<i32>} : memref<128x128xf32, #tpu.memory_space<vmem>>, vector<128x128xf32>,
    } else {
    }
    %c0 = arith.constant 0 : index
    %c0_4 = arith.constant 0 : index
    %8 = vector.load %arg3[%c0, %c0_4] : memref<256x2xf32, #tpu.memory_space<vmem>>, vector<256x2xf32>
    %c0_5 = arith.constant 0 : index
    %c0_6 = arith.constant 0 : index
    %c0_7 = arith.constant 0 : index
    %9 = vector.load %arg6[%c0_5, %c0_6, %c0_7] : memref<1x2x4xf32, #tpu.memory_space<vmem>>, vector<1x2x4xf32>
    %10 = vector.shape_cast %9 : vector<1x2x4xf32> to vector<2x4xf32>
    %cst = arith.constant dense<0.000000e+00> : vector<256x4xf32>
    %11 = tpu.matmul %8, %10, %cst {dimension_numbers = #tpu.dot_dimension_numbers<[1], [0], [0], [1], [0, 0, 1, 1], [], []>} : vector<256x2xf32>, vector<2x4xf32>, vector<256x4xf32> -> vector<256x4xf32>
    %c0_8 = arith.constant 0 : index
    %c0_9 = arith.constant 0 : index
    %c0_10 = arith.constant 0 : index
    %12 = vector.load %arg7[%c0_8, %c0_9, %c0_10] : memref<1x1x4xf32, #tpu.memory_space<vmem>>, vector<1x1x4xf32>
    %13 = vector.shape_cast %12 : vector<1x1x4xf32> to vector<1x4xf32>
    %14 = vector.broadcast %13 : vector<1x4xf32> to vector<256x4xf32>
    %15 = arith.addf %11, %14 : vector<256x4xf32>
    %16 = math.tanh %15 : vector<256x4xf32>
    %17 = arith.mulf %16, %16 : vector<256x4xf32>
    %c0_11 = arith.constant 0 : index
    %c0_12 = arith.constant 0 : index
    %c0_13 = arith.constant 0 : index
    %18 = vector.load %arg8[%c0_11, %c0_12, %c0_13] : memref<1x4x3xf32, #tpu.memory_space<vmem>>, vector<1x4x3xf32>
    %19 = vector.shape_cast %18 : vector<1x4x3xf32> to vector<4x3xf32>
    %cst_14 = arith.constant dense<0.000000e+00> : vector<256x3xf32>
    %20 = tpu.matmul %17, %19, %cst_14 {dimension_numbers = #tpu.dot_dimension_numbers<[1], [0], [0], [1], [0, 0, 1, 1], [], []>} : vector<256x4xf32>, vector<4x3xf32>, vector<256x3xf32> -> vector<256x3xf32>
    %c0_15 = arith.constant 0 : index
    %c0_16 = arith.constant 0 : index
    %c0_17 = arith.constant 0 : index
    %21 = vector.load %arg9[%c0_15, %c0_16, %c0_17] : memref<1x4x3xf32, #tpu.memory_space<vmem>>, vector<1x4x3xf32>
    %22 = vector.shape_cast %21 : vector<1x4x3xf32> to vector<4x3xf32>
    %cst_18 = arith.constant dense<0.000000e+00> : vector<256x3xf32>
    %23 = tpu.matmul %16, %22, %cst_18 {dimension_numbers = #tpu.dot_dimension_numbers<[1], [0], [0], [1], [0, 0, 1, 1], [], []>} : vector<256x4xf32>, vector<4x3xf32>, vector<256x3xf32> -> vector<256x3xf32>
    %cst_19 = arith.constant 2.000000e+00 : f32
    %24 = vector.broadcast %cst_19 : f32 to vector<256x3xf32>
    %25 = arith.mulf %24, %23 : vector<256x3xf32>
    %26 = arith.subf %20, %25 : vector<256x3xf32>
    %c0_20 = arith.constant 0 : index
    %c0_21 = arith.constant 0 : index
    %c0_22 = arith.constant 0 : index
    %27 = vector.load %arg10[%c0_20, %c0_21, %c0_22] : memref<1x1x3xf32, #tpu.memory_space<vmem>>, vector<1x1x3xf32>
    %28 = vector.shape_cast %27 : vector<1x1x3xf32> to vector<1x3xf32>
    %29 = vector.broadcast %28 : vector<1x3xf32> to vector<256x3xf32>
    %30 = arith.addf %26, %29 : vector<256x3xf32>
    %cst_23 = arith.constant -5.000000e-01 : f32
    %31 = vector.broadcast %cst_23 : f32 to vector<256x3xf32>
    %32 = arith.mulf %31, %30 : vector<256x3xf32>
    %cst_24 = arith.constant 0.000000e+00 : f32
    %33 = vector.broadcast %cst_24 : f32 to vector<256x3xf32>
    %34 = arith.minimumf %32, %33 : vector<256x3xf32>
    %35 = math.exp %34 : vector<256x3xf32>
    %c0_25 = arith.constant 0 : index
    %c0_26 = arith.constant 0 : index
    %c0_27 = arith.constant 0 : index
    %36 = vector.load %arg13[%c0_25, %c0_26, %c0_27] : memref<1x3x128xf32, #tpu.memory_space<vmem>>, vector<1x3x128xf32>
    %37 = vector.shape_cast %36 : vector<1x3x128xf32> to vector<3x128xf32>
    %cst_28 = arith.constant dense<0.000000e+00> : vector<256x128xf32>
    %38 = tpu.matmul %35, %37, %cst_28 {dimension_numbers = #tpu.dot_dimension_numbers<[1], [0], [0], [1], [0, 0, 1, 1], [], []>} : vector<256x3xf32>, vector<3x128xf32>, vector<256x128xf32> -> vector<256x128xf32>
    %c0_29 = arith.constant 0 : index
    %c0_30 = arith.constant 0 : index
    %39 = vector.load %arg4[%c0_29, %c0_30] : memref<256x1xi32, #tpu.memory_space<vmem>>, vector<256x1xi32>
    %40 = tpu.iota {dimensions = array<i32: 1>} : vector<256x128xi32>
    %41 = vector.broadcast %39 : vector<256x1xi32> to vector<256x128xi32>
    %42 = arith.cmpi eq, %41, %40 : vector<256x128xi32>
    %cst_31 = arith.constant 1.000000e+00 : f32
    %cst_32 = arith.constant 0.000000e+00 : f32
    %43 = vector.broadcast %cst_31 : f32 to vector<256x128xf32>
    %44 = vector.broadcast %cst_32 : f32 to vector<256x128xf32>
    %45 = arith.select %42, %43, %44 : vector<256x128xi1>, vector<256x128xf32>
    %46 = arith.truncf %45 : vector<256x128xf32> to vector<256x128xbf16>
    %c0_33 = arith.constant 0 : index
    %c0_34 = arith.constant 0 : index
    %47 = vector.load %arg17[%c0_33, %c0_34] : memref<128x128xbf16, #tpu.memory_space<vmem>>, vector<128x128xbf16>
    %cst_35 = arith.constant dense<0.000000e+00> : vector<256x128xf32>
    %48 = tpu.matmul %46, %47, %cst_35 {dimension_numbers = #tpu.dot_dimension_numbers<[1], [0], [0], [1], [0, 0, 1, 1], [], []>} : vector<256x128xbf16>, vector<128x128xbf16>, vector<256x128xf32> -> vector<256x128xf32>
    %49 = arith.mulf %38, %48 : vector<256x128xf32>
    %c0_36 = arith.constant 0 : index
    %c0_37 = arith.constant 0 : index
    %c0_38 = arith.constant 0 : index
    %50 = vector.load %arg14[%c0_36, %c0_37, %c0_38] : memref<1x128x128xf32, #tpu.memory_space<vmem>>, vector<1x128x128xf32>
    %51 = vector.shape_cast %50 : vector<1x128x128xf32> to vector<128x128xf32>
    %cst_39 = arith.constant dense<0.000000e+00> : vector<256x128xf32>
    %52 = tpu.matmul %49, %51, %cst_39 {dimension_numbers = #tpu.dot_dimension_numbers<[1], [0], [0], [1], [0, 0, 1, 1], [], []>} : vector<256x128xf32>, vector<128x128xf32>, vector<256x128xf32> -> vector<256x128xf32>
    %53 = tpu.iota {dimensions = array<i32: 0>} : vector<128x256xi32>
    %c0_40 = arith.constant 0 : index
    %c0_41 = arith.constant 0 : index
    %54 = vector.load %arg5[%c0_40, %c0_41] : memref<1x256xi32, #tpu.memory_space<vmem>>, vector<1x256xi32>
    %55 = vector.broadcast %54 : vector<1x256xi32> to vector<128x256xi32>
    %56 = arith.cmpi eq, %53, %55 : vector<128x256xi32>
    %cst_42 = arith.constant 1.000000e+00 : f32
    %cst_43 = arith.constant 0.000000e+00 : f32
    %57 = vector.broadcast %cst_42 : f32 to vector<128x256xf32>
    %58 = vector.broadcast %cst_43 : f32 to vector<128x256xf32>
    %59 = arith.select %56, %57, %58 : vector<128x256xi1>, vector<128x256xf32>
    %60 = arith.truncf %59 : vector<128x256xf32> to vector<128x256xbf16>
    %c0_44 = arith.constant 0 : index
    %c0_45 = arith.constant 0 : index
    %61 = vector.load %arg18[%c0_44, %c0_45] : memref<128x128xf32, #tpu.memory_space<vmem>>, vector<128x128xf32>
    %62 = arith.truncf %52 : vector<256x128xf32> to vector<256x128xbf16>
    %cst_46 = arith.constant dense<0.000000e+00> : vector<128x128xf32>
    %63 = tpu.matmul %60, %62, %cst_46 {dimension_numbers = #tpu.dot_dimension_numbers<[1], [0], [0], [1], [0, 0, 1, 1], [], []>} : vector<128x256xbf16>, vector<256x128xbf16>, vector<128x128xf32> -> vector<128x128xf32>
    %64 = arith.addf %61, %63 : vector<128x128xf32>
    %c0_47 = arith.constant 0 : index
    %c0_48 = arith.constant 0 : index
    %65 = vector.load %arg18[%c0_47, %c0_48] : memref<128x128xf32, #tpu.memory_space<vmem>>, vector<128x128xf32>
    tpu.vector_store %arg18[%c0_47, %c0_48], %64 {strides = array<i32>} : memref<128x128xf32, #tpu.memory_space<vmem>>, vector<128x128xf32>,
    %c0_i32_49 = arith.constant 0 : i32
    %66 = arith.cmpi eq, %arg1, %c0_i32_49 : i32
    %67 = arith.extui %66 : i1 to i32
    %c0_i32_50 = arith.constant 0 : i32
    %68 = arith.cmpi ne, %67, %c0_i32_50 : i32
    scf.if %68 {
      %c0_53 = arith.constant 0 : index
      %c0_54 = arith.constant 0 : index
      %74 = vector.load %arg18[%c0_53, %c0_54] : memref<128x128xf32, #tpu.memory_space<vmem>>, vector<128x128xf32>
      %c0_55 = arith.constant 0 : index
      %c0_56 = arith.constant 0 : index
      %c0_57 = arith.constant 0 : index
      %75 = vector.load %arg12[%c0_55, %c0_56, %c0_57] : memref<1x1x128xf32, #tpu.memory_space<vmem>>, vector<1x1x128xf32>
      %76 = vector.shape_cast %75 : vector<1x1x128xf32> to vector<1x128xf32>
      %77 = vector.broadcast %76 : vector<1x128xf32> to vector<128x128xf32>
      %78 = arith.addf %74, %77 : vector<128x128xf32>
      %c0_58 = arith.constant 0 : index
      %c0_59 = arith.constant 0 : index
      %79 = vector.load %arg16[%c0_58, %c0_59] : memref<128x128xf32, #tpu.memory_space<vmem>>, vector<128x128xf32>
      tpu.vector_store %arg16[%c0_58, %c0_59], %78 {strides = array<i32>} : memref<128x128xf32, #tpu.memory_space<vmem>>, vector<128x128xf32>,
    } else {
    }
    %c0_i32_51 = arith.constant 0 : i32
    %69 = arith.cmpi eq, %arg1, %c0_i32_51 : i32
    %c2_i32 = arith.constant 2 : i32
    %70 = arith.cmpi eq, %arg0, %c2_i32 : i32
    %71 = arith.andi %69, %70 : i1
    %72 = arith.extui %71 : i1 to i32
    %c0_i32_52 = arith.constant 0 : i32
    %73 = arith.cmpi ne, %72, %c0_i32_52 : i32
    scf.if %73 {
      %c0_53 = arith.constant 0 : index
      %c0_54 = arith.constant 0 : index
      %74 = vector.load %arg16[%c0_53, %c0_54] : memref<128x128xf32, #tpu.memory_space<vmem>>, vector<128x128xf32>
      %c0_55 = arith.constant 0 : index
      %c0_56 = arith.constant 0 : index
      %75 = vector.load %arg15[%c0_55, %c0_56] : memref<128x128xf32, #tpu.memory_space<vmem>>, vector<128x128xf32>
      tpu.vector_store %arg15[%c0_55, %c0_56], %74 {strides = array<i32>} : memref<128x128xf32, #tpu.memory_space<vmem>>, vector<128x128xf32>,
    } else {
    }
    return
  }
  func.func @transform_0(%arg0: i32, %arg1: i32) -> (i32, i32) {
    %c0_i32 = arith.constant 0 : i32
    %c0_i32_0 = arith.constant 0 : i32
    %c0_i32_1 = arith.constant 0 : i32
    return %c0_i32, %c0_i32_0 : i32, i32
  }
  func.func @transform_1(%arg0: i32, %arg1: i32) -> (i32, i32) {
    %c0_i32 = arith.constant 0 : i32
    %c0_i32_0 = arith.constant 0 : i32
    return %arg1, %c0_i32 : i32, i32
  }
  func.func @transform_2(%arg0: i32, %arg1: i32) -> (i32, i32) {
    %c0_i32 = arith.constant 0 : i32
    %c0_i32_0 = arith.constant 0 : i32
    return %arg1, %c0_i32 : i32, i32
  }
  func.func @transform_3(%arg0: i32, %arg1: i32) -> (i32, i32) {
    %c0_i32 = arith.constant 0 : i32
    %c0_i32_0 = arith.constant 0 : i32
    return %c0_i32, %arg1 : i32, i32
  }
  func.func @transform_4(%arg0: i32, %arg1: i32) -> (i32, i32, i32) {
    %c0_i32 = arith.constant 0 : i32
    %c0_i32_0 = arith.constant 0 : i32
    %c0_i32_1 = arith.constant 0 : i32
    return %arg0, %c0_i32, %c0_i32_0 : i32, i32, i32
  }
  func.func @transform_5(%arg0: i32, %arg1: i32) -> (i32, i32, i32) {
    %c0_i32 = arith.constant 0 : i32
    %c0_i32_0 = arith.constant 0 : i32
    %c0_i32_1 = arith.constant 0 : i32
    return %arg0, %c0_i32, %c0_i32_0 : i32, i32, i32
  }
  func.func @transform_6(%arg0: i32, %arg1: i32) -> (i32, i32, i32) {
    %c0_i32 = arith.constant 0 : i32
    %c0_i32_0 = arith.constant 0 : i32
    %c0_i32_1 = arith.constant 0 : i32
    return %arg0, %c0_i32, %c0_i32_0 : i32, i32, i32
  }
  func.func @transform_7(%arg0: i32, %arg1: i32) -> (i32, i32, i32) {
    %c0_i32 = arith.constant 0 : i32
    %c0_i32_0 = arith.constant 0 : i32
    %c0_i32_1 = arith.constant 0 : i32
    return %arg0, %c0_i32, %c0_i32_0 : i32, i32, i32
  }
  func.func @transform_8(%arg0: i32, %arg1: i32) -> (i32, i32, i32) {
    %c0_i32 = arith.constant 0 : i32
    %c0_i32_0 = arith.constant 0 : i32
    %c0_i32_1 = arith.constant 0 : i32
    return %arg0, %c0_i32, %c0_i32_0 : i32, i32, i32
  }
  func.func @transform_9(%arg0: i32, %arg1: i32) -> (i32, i32, i32) {
    %c0_i32 = arith.constant 0 : i32
    %c0_i32_0 = arith.constant 0 : i32
    %c0_i32_1 = arith.constant 0 : i32
    return %arg0, %c0_i32, %c0_i32_0 : i32, i32, i32
  }
  func.func @transform_10(%arg0: i32, %arg1: i32) -> (i32, i32, i32) {
    %c0_i32 = arith.constant 0 : i32
    %c0_i32_0 = arith.constant 0 : i32
    %c0_i32_1 = arith.constant 0 : i32
    return %arg0, %c0_i32, %c0_i32_0 : i32, i32, i32
  }
  func.func @transform_11(%arg0: i32, %arg1: i32) -> (i32, i32, i32) {
    %c0_i32 = arith.constant 0 : i32
    %c0_i32_0 = arith.constant 0 : i32
    %c0_i32_1 = arith.constant 0 : i32
    return %arg0, %c0_i32, %c0_i32_0 : i32, i32, i32
  }
  func.func @transform_12(%arg0: i32, %arg1: i32) -> (i32, i32, i32) {
    %c0_i32 = arith.constant 0 : i32
    %c0_i32_0 = arith.constant 0 : i32
    %c0_i32_1 = arith.constant 0 : i32
    return %arg0, %c0_i32, %c0_i32_0 : i32, i32, i32
  }
  func.func @transform_13(%arg0: i32, %arg1: i32) -> (i32, i32) {
    %c0_i32 = arith.constant 0 : i32
    %c0_i32_0 = arith.constant 0 : i32
    %c0_i32_1 = arith.constant 0 : i32
    return %c0_i32, %c0_i32_0 : i32, i32
  }
}

</mosaic_0001>

<bundles_post_ra>
// kernel: tpu_custom_call.1
= control target key start
LH: loop header
LB: loop body
LE: loop exit
PB: predicated region body
PF: predicated region fallthrough
CT: control target
= control target key end

     0   :  { %s6557_s0 = inlined_call_operand.vmem [shape: f32[128,128], index: 0, kind: input, shape index: {}]   ;;  %s6558_s1 = inlined_call_operand.vmem [shape: f32[256,2], index: 1, kind: input, shape index: {}]   ;;  %s6559_s2 = inlined_call_operand.vmem [shape: s32[256,1], index: 2, kind: input, shape index: {}]   ;;  %s6560_s3 = inlined_call_operand.hbm [shape: s32[1,256], index: 3, kind: input, shape index: {}]   ;;  %s6561_s4 = inlined_call_operand.hbm [shape: f32[3,2,4], index: 4, kind: input, shape index: {}]   ;;  %s6562_s5 = inlined_call_operand.vmem [shape: f32[3,1,4], index: 5, kind: input, shape index: {}]   ;;  %s6563_s6 = inlined_call_operand.vmem [shape: f32[3,4,3], index: 6, kind: input, shape index: {}]   ;;  %s6564_s7 = inlined_call_operand.vmem [shape: f32[3,4,3], index: 7, kind: input, shape index: {}]   ;;  %s6565_s8 = inlined_call_operand.hbm [shape: f32[3,1,3], index: 8, kind: input, shape index: {}]   ;;  %s6566_s9 = inlined_call_operand.hbm [shape: bf16[3,128,128], index: 9, kind: input, shape index: {}]   ;;  %s6567_s10 = inlined_call_operand.hbm [shape: f32[3,1,128], index: 10, kind: input, shape index: {}]   ;;  %s6568_s11 = inlined_call_operand.hbm [shape: f32[3,3,128], index: 11, kind: input, shape index: {}]   ;;  %s6569_s12 = inlined_call_operand.vmem [shape: f32[3,128,128], index: 12, kind: input, shape index: {}]   ;;  %s6570_s13 = inlined_call_operand.hbm [shape: f32[128,128], index: 13, kind: output, shape index: {}]  }
   0x1   :  { %6580 = sst [smem:[#allocation25_spill]] %s6557_s0 }
   0x2   :  { %6581 = sst [smem:[#allocation26_spill]] %s6558_s1 }
   0x3   :  { %6582 = sst [smem:[#allocation27_spill]] %s6559_s2 }
   0x4   :  { %6583 = sst [smem:[#allocation28_spill]] %s6560_s3 }
   0x5   :  { %6584 = sst [smem:[#allocation29_spill]] %s6561_s4 }
   0x6   :  { %6585 = sst [smem:[#allocation30_spill]] %s6563_s6 }
   0x7   :  { %6586 = sst [smem:[#allocation31_spill]] %s6565_s8 }
   0x8   :  { %6587 = sst [smem:[#allocation32_spill]] %s6566_s9 }
   0x9   :  { %6588 = sst [smem:[#allocation33_spill]] %s6569_s12 }
   0xa   :  { %6589 = sst [smem:[#allocation34_spill]] %s6570_s13 }
   0xb   :  { %18 = vsyncpa [#allocation6], 0 }
   0xc   :  { %19 = vsyncpa [#allocation9], 0 }
   0xd   :  { %21 = vsyncpa [#allocation9 + $0x1], 0 }
   0xe   :  { %22 = vsyncpa [#allocation12], 0 }
   0xf   :  { %24 = vsyncpa [#allocation12 + $0x1], 0 }
  0x10   :  { %25 = vsyncpa [#allocation15], 0 }
  0x11   :  { %27 = vsyncpa [#allocation15 + $0x1], 0 }
  0x12   :  { %28 = vsyncpa [#allocation7], 0  ;;  %s5557_s25 = smov 0   ;;  %s5559_s26 = smov 0  }
  0x13   :  { %s5561_s27 = smov 0   ;;  %s5563_s28 = smov 0  }
  0x14   :  { %s5565_s29 = smov 0   ;;  %s5567_s30 = smov 0  }
  0x15 LB: > { %6590 = sst [smem:[#allocation22_spill]] %s5460_s27  ;;  %s46_s14 = sadd.s32 1, %s5468_s29  ;;  %s5472_s30 = sphi %s5567_s30, %s34_s30   ;;  %s5468_s29 = sphi %s5565_s29, %s6655_s29   ;;  %s5464_s28 = sphi %s5563_s28, %s6654_s28   ;;  %s5460_s27 = sphi %s5561_s27, %s6650_s27   ;;  %s5456_s26 = sphi %s5559_s26, %s6653_s26   ;;  %s5452_s25 = sphi %s5557_s25, %s6652_s25  }
  0x16   : > { %s152_s15 = sadd.s32 1, %s5460_s27  ;;  %p48_p0 = scmp.ge.s32.totalorder %s46_s14, 3 }
  0x17   : > { %p159_p1 = scmp.ne.s32.totalorder %s5460_s27, %s5456_s26  ;;  %p160_p2 = scmp.eq.s32.totalorder %s5472_s30, 0 }
  0x18   : > { %s6657_s14 = smov (%p48_p0, %s46_s14), 0  ;;  %p5010_p4 = scmp.lt.s32.totalorder %s5472_s30, 3 }
  0x19   : > { %6591 = sst [smem:[#allocation23_spill]] %s6657_s14  ;;  %p161_p3 = por %p160_p2, %p159_p1 }
  0x1a   : > { %s149_s16 = ssub.s32 %s5468_s29, %s6657_s14  ;;  %s6573_s17 = sand.u32 1, %s5472_s30  }
  0x1b   : > { %p150_p5 = scmp.eq.s32.totalorder %s149_s16, 0  ;;  %s5599_s18 = sand.u32 1, %s5460_s27  }
  0x1c   : > { %s4006_s19 = sshll.u32 %s5468_s29, 5  ;;  %s4005_s21 = sshll.u32 %s5599_s18, 1 }
  0x1d   : > { %s5603_s20 = scalar_select %p150_p5, %s5460_s27, %s152_s15  }
  0x1e   : > { %s6593_s4 = sld [smem:[#allocation29_spill]]  ;;  %p5609_p6 = pnand %p5010_p4, %p161_p3 }
  0x1f   : > { %6592 = sst [smem:[#allocation24_spill]] %s5603_s20  ;;  %s457_s2 = scalar_lea.vmem [#allocation8], %s4005_s21 }
  0x20   : > { %s464_s14 = sshll.u32 %s457_s2, 4  ;;  %s5615_s16 = scalar_lea.sflag [#allocation9], %s6573_s17  ;;  %s465_s14 = int_to_ptr.vmem [resolvable:$true] %s464_s14 }
  0x21   : > { %p5619_p7 = pneg %p5609_p6  ;;  %s5229_s20 = scalar_lea.vmem %s465_s14, 32 }
  0x22   : > { %p5230_p8 = scmp.ne.s32.totalorder %s465_s14, %s5229_s20 }
  0x24   : > { %s462_s24 = scalar_lea.hbm %s6593_s4, %s4006_s19  ;;  %p5232_p9 = pnand %p5230_p8, %p5619_p7 }
  0x25   : > { %s5474_s19 = smov [#allocation8]  }
  0x26   : > { %p5233_p10 = pneg %p5232_p9  ;;  %s5234_s22 = sshll.u32 %s5474_s19, 4  ;;  %s5235_s22 = int_to_ptr.vmem [resolvable:$false] %s5234_s22 }
  0x27   : > { %s5236_s21 = scalar_lea.vmem %s5235_s22, 64  ;;  %p5237_p11 = scmp.lt.s32.totalorder %s465_s14, %s5235_s22 }
  0x28   : > { %p5238_p12 = scmp.lt.s32.totalorder %s5236_s21, %s5229_s20 }
  0x2a   : > { %p5239_p13 = por %p5238_p12, %p5237_p11 }
  0x2c   : > { %p5240_p0 = pnand %p5239_p13, %p5233_p10 }
  0x2e   : > { %5243 = shalt.err (!%p5240_p0)
}
  0x2f   : > { %4996 = dma.hbm_to_vmem [thread:$0]  (!%p5609_p6), %s462_s24, 32, %s465_s14, %s5615_s16  }
  0x30   : > { %s4008_s2 = sshll.u32 %s5599_s18, 6  ;;  %s4260_s23 = sshll.u32 %s5468_s29, 10 }
  0x31   : > { %s6596_s9 = sld [smem:[#allocation32_spill]]  ;;  %s512_s27 = scalar_lea.vmem [#allocation11], %s4008_s2 }
  0x32   : > { %s519_s22 = sshll.u32 %s512_s27, 4  ;;  %s6597_s20 = sand.u32 1, %s5472_s30   ;;  %s520_s22 = int_to_ptr.vmem [resolvable:$true] %s519_s22 }
  0x33   : > { %s5635_s21 = scalar_lea.sflag [#allocation12], %s6597_s20  ;;  %s5257_s1 = scalar_lea.vmem %s520_s22, 1024 }
  0x34   : > { %p5258_p1 = scmp.ne.s32.totalorder %s520_s22, %s5257_s1  ;;  %s5475_s0 = smov [#allocation11]  }
  0x35   : > { %s5262_s12 = sshll.u32 %s5475_s0, 4  ;;  %s5263_s12 = int_to_ptr.vmem [resolvable:$false] %s5262_s12 }
  0x36   : > { %p5260_p2 = pnand %p5258_p1, %p5619_p7  ;;  %s5264_s14 = scalar_lea.vmem %s5263_s12, 2048 }
  0x37   : > { %s518_s19 = scalar_lea.hbm %s6596_s9, %s4260_s23  ;;  %p5265_p4 = scmp.lt.s32.totalorder %s520_s22, %s5263_s12 }
  0x38   : > { %p5261_p3 = pneg %p5260_p2  ;;  %p5266_p5 = scmp.lt.s32.totalorder %s5264_s14, %s5257_s1 }
  0x3a   : > { %p5267_p8 = por %p5266_p5, %p5265_p4 }
  0x3c   : > { %p5268_p9 = pnand %p5267_p8, %p5261_p3 }
  0x3e   : > { %5271 = shalt.err (!%p5268_p9)
}
  0x3f   : > { %s5476_s4 = smov 64   ;;  %s5477_s27 = smov 4  }
  0x40   : > { %5002 = dma.hbm_to_vmem [thread:$0]  (!%p5609_p6), %s518_s19, 1024, %s520_s22, %s5635_s21, %s5476_s4, %s5476_s4, %s5477_s27  }
  0x41   : > { %s5643_s0 = sadd.s32 4294967295, %s5472_s30   ;;  %p165_p10 = scmp.ne.s32.totalorder %s5456_s26, %s5452_s25 }
  0x42   : > { %p6577_p11 = scmp.eq.s32.totalorder %s5643_s0, 0  ;;  %p4000_p12 = scmp.ge.s32.totalorder %s5472_s30, 1 }
  0x43   : > { %p405_p13 = scmp.lt.s32.totalorder %s5472_s30, 4  ;;  %s5478_s17 = smov [#allocation5]  }
  0x44   : > { %p5652_p0 = por %p6577_p11, %p165_p10  ;;  %s442_s24 = sshll.u32 %s5478_s17, 4  ;;  %s5660_s24 = int_to_ptr.vmem [resolvable:$true] %s442_s24 }
  0x45   : > { %p5656_p1 = pnand %p4000_p12, %p405_p13  ;;  %s4007_s25 = sshll.u32 %s5468_s29, 4 }
  0x46   : > { %s6598_s1 = scalar_select %p5652_p0, 1, 0 }
  0x47   : > { %s6599_s12 = scalar_select %p5656_p1, 1, 0 }
  0x48   : > { %p4989_p2 = pneg %p5656_p1  ;;  %s6600_s8 = sld [smem:[#allocation31_spill]] }
  0x49   : > { %s494_s22 = scalar_lea.vmem [#allocation10], %s5599_s18  ;;  %s5479_s27 = smov [#allocation10]  }
  0x4a   : > { %s501_s20 = sshll.u32 %s494_s22, 4  ;;  %p5673_p3 = pnand %p4989_p2, %p6577_p11  ;;  %s502_s20 = int_to_ptr.vmem [resolvable:$true] %s501_s20 }
  0x4b   : > { %s5285_s4 = scalar_lea.vmem %s502_s20, 16  ;;  %s5290_s17 = sshll.u32 %s5479_s27, 4  ;;  %s5291_s17 = int_to_ptr.vmem [resolvable:$false] %s5290_s17 }
  0x4c   : > { %p5286_p4 = scmp.ne.s32.totalorder %s502_s20, %s5285_s4  ;;  %s5292_s9 = scalar_lea.vmem %s5291_s17, 32 }
  0x4d   : > { %p5293_p9 = scmp.lt.s32.totalorder %s502_s20, %s5291_s17  ;;  %p5294_p10 = scmp.lt.s32.totalorder %s5292_s9, %s5285_s4 }
  0x4e   : > { %s499_s19 = scalar_lea.hbm %s6600_s8, %s4007_s25  ;;  %p5288_p5 = pnand %p5286_p4, %p5619_p7 }
  0x4f   : > { %p5295_p12 = por %p5294_p10, %p5293_p9 }
  0x50   : > { %p5289_p8 = pneg %p5288_p5 }
  0x52   : > { %p5296_p13 = pnand %p5295_p12, %p5289_p8 }
  0x54   : > { %5299 = shalt.err (!%p5296_p13)
}
  0x55   : > { %4999 = dma.hbm_to_vmem [thread:$0]  (!%p5609_p6), %s499_s19, 16, %s502_s20, %s5615_s16  }
  0x56   : > { %p5302_p2 = pneg %p5673_p3  ;;  %s5311_s2 = scalar_lea.vmem %s5660_s24, 32 }
  0x57   : > { %p5312_p4 = scmp.ne.s32.totalorder %s5660_s24, %s5311_s2  ;;  %p5319_p0 = scmp.lt.s32.totalorder %s5660_s24, %s5660_s24 }
  0x58   : > { %p5320_p1 = scmp.lt.s32.totalorder %s5311_s2, %s5311_s2 }
  0x59   : > { %p5314_p5 = pnand %p5312_p4, %p5302_p2 }
  0x5a   : > { %p5321_p9 = por %p5320_p1, %p5319_p0 }
  0x5b   : > { %p5315_p11 = pneg %p5314_p5 }
  0x5d   : > { %p5322_p8 = pnand %p5321_p9, %p5315_p11 }
  0x5f   : > { %5325 = shalt.err (!%p5322_p8)
}
  0x60   : > { %s6602_s3 = sld [smem:[#allocation28_spill]]  ;;  %s537_s22 = scalar_lea.hbm %s6567_s10, %s4007_s25 }
  0x61   : > { %s532_s20 = scalar_lea.vmem [#allocation13], %s5599_s18  ;;  %s5480_s14 = smov [#allocation13]  }
  0x62   : > { %s539_s4 = sshll.u32 %s532_s20, 4  ;;  %s5344_s17 = sshll.u32 %s5480_s14, 4  ;;  %s540_s4 = int_to_ptr.vmem [resolvable:$true] %s539_s4  ;;  %s5345_s17 = int_to_ptr.vmem [resolvable:$false] %s5344_s17 }
  0x63   : > { %s5339_s27 = scalar_lea.vmem %s540_s4, 16  ;;  %s5346_s2 = scalar_lea.vmem %s5345_s17, 32 }
  0x64   : > { %p5340_p11 = scmp.ne.s32.totalorder %s540_s4, %s5339_s27  ;;  %p5347_p10 = scmp.lt.s32.totalorder %s540_s4, %s5345_s17 }
  0x65   : > { %p5348_p12 = scmp.lt.s32.totalorder %s5346_s2, %s5339_s27 }
  0x66   : > { %4992 = dma.hbm_to_vmem [thread:$0]  (!%p5673_p3), %s6602_s3, 32, %s5660_s24, [#allocation6]  }
  0x67   : > { %p5342_p0 = pnand %p5340_p11, %p5619_p7  ;;  %p5349_p3 = por %p5348_p12, %p5347_p10 }
  0x69   : > { %p5343_p1 = pneg %p5342_p0 }
  0x6b   : > { %p5350_p13 = pnand %p5349_p3, %p5343_p1 }
  0x6d   : > { %5353 = shalt.err (!%p5350_p13)
}
  0x6e   : > { %5005 = dma.hbm_to_vmem [thread:$0]  (!%p5609_p6), %s537_s22, 16, %s540_s4, %s5635_s21  }
  0x6f   : > { %s4012_s24 = sshll.u32 %s5599_s18, 2  ;;  %s4013_s25 = sshll.u32 %s5468_s29, 6 }
  0x70   : > { %s555_s16 = scalar_lea.hbm %s6568_s11, %s4013_s25  ;;  %s550_s19 = scalar_lea.vmem [#allocation14], %s4012_s24 }
  0x71   : > { %s557_s20 = sshll.u32 %s550_s19, 4  ;;  %s547_s27 = scalar_lea.sflag [#allocation15], %s5599_s18  ;;  %s558_s20 = int_to_ptr.vmem [resolvable:$true] %s557_s20 }
  0x72   : > { %s5367_s14 = scalar_lea.vmem %s558_s20, 64  ;;  %s5481_s17 = smov [#allocation14]  }
  0x73   : > { %p5368_p2 = scmp.ne.s32.totalorder %s558_s20, %s5367_s14  ;;  %s5372_s2 = sshll.u32 %s5481_s17, 4  ;;  %s5373_s2 = int_to_ptr.vmem [resolvable:$false] %s5372_s2 }
  0x74   : > { %s5374_s3 = scalar_lea.vmem %s5373_s2, 128  ;;  %p5375_p9 = scmp.lt.s32.totalorder %s558_s20, %s5373_s2 }
  0x75   : > { %p5370_p4 = pnand %p5368_p2, %p5619_p7  ;;  %p5376_p8 = scmp.lt.s32.totalorder %s5374_s3, %s5367_s14 }
  0x77   : > { %p5371_p5 = pneg %p5370_p4  ;;  %p5377_p11 = por %p5376_p8, %p5375_p9 }
  0x79   : > { %p5378_p0 = pnand %p5377_p11, %p5371_p5 }
  0x7b   : > { %5381 = shalt.err (!%p5378_p0)
}
  0x7c   : > { %5008 = dma.hbm_to_vmem [thread:$0]  (!%p5609_p6), %s555_s16, 64, %s558_s20, %s547_s27  }
  0x7d   : > { %p6603_p1 = scmp.ne.s32.totalorder %s6599_s12, 0 }
  0x7e   : > { %p6604_p10 = scmp.eq.s32.totalorder (!%p6603_p1), %s5643_s0, 0 }
  0x7f   : > { %574 = sbr.rel (%p6603_p1) target bundleno = 1386 (0x56a), region = 72 }
  0x84   : > { %5431 = dma.done.wait (%p6604_p10), [#allocation6], 32   ;;  %p6605_p7 = pmov %p6604_p10 }
  0x85   : > { %s580_s18 = sand.u32 1, %s5643_s0   ;;  %s5723_s3 = sand.u32 1, %s5456_s26  }
  0x86   : > { %5433 = vsyncadd (%p6605_p7), [#allocation6], 4294967264  ;;  %s4016_s15 = sshll.u32 %s5723_s3, 1  ;;  %s581_s21 = scalar_lea.sflag [#allocation9], %s580_s18 }
  0x87   : > { %s5726_s13 = scalar_lea.vmem [#allocation8], %s4016_s15  ;;  %p6606_p6 = scmp.ne.s32.totalorder %s6598_s1, 0 }
  0x89   : > { %5435 = dma.done.wait (%p6606_p6), %s581_s21, 48  }
  0x8a   : > { %5437 = vsyncadd (%p6606_p6), %s581_s21, 4294967248  ;;  %s4017_s12 = sshll.u32 %s5723_s3, 6  ;;  %s598_s4 = scalar_lea.sflag [#allocation12], %s580_s18 }
  0x8b   : > { %s5734_s24 = scalar_lea.vmem [#allocation11], %s4017_s12 }
  0x8c   : > { %5439 = dma.done.wait (%p6606_p6), %s598_s4, 1040  }
  0x8d   : > { %5441 = vsyncadd (%p6606_p6), %s598_s4, 4294966256  ;;  %s4018_s25 = sshll.u32 %s5723_s3, 2  ;;  %s615_s23 = scalar_lea.sflag [#allocation15], %s5723_s3 }
  0x8e   : > { %s5743_s16 = scalar_lea.vmem [#allocation14], %s4018_s25 }
  0x8f   : > { %5443 = dma.done.wait (%p6606_p6), %s615_s23, 64  }
  0x90   : > { %5445 = vsyncadd (%p6606_p6), %s615_s23, 4294967232  ;;  %p713_p12 = scmp.lt.s32.totalorder %s5464_s28, 2  ;;  %p730_p3 = scmp.eq.s32.totalorder %s5464_s28, 0 }
  0x91   : > { %s6607_s6 = sld [smem:[#allocation30_spill]] }
  0x92   : > { %s5752_s19 = scalar_select %p713_p12, %s5464_s28, 2 }
  0x93   : > { %s6608_s9 = sld [smem:[#allocation33_spill]] }
  0x94   : > { %s4019_s17 = sshll.u32 %s5752_s19, 2  ;;  %s4261_s4 = sshll.u32 %s5752_s19, 7 }
  0x95   : > { %s5767_s12 = scalar_lea.vmem %s6564_s7, %s4019_s17  ;;  %735 = sbr.rel (!%p730_p3) target bundleno = 165 (0xa5), region = 100 }
  0x96   : > { %s6609_s14 = sld [smem:[#allocation25_spill]] (%p730_p3) }
  0x97   : > { %s5762_s1 = scalar_lea.vmem %s6607_s6, %s4019_s17 }
  0x99   : > { %s5773_s22 = scalar_lea.vmem %s6608_s9, %s4261_s4 }
  0x9c   : > { %v736_v0 = vld [vmem:[%s6609_s14] sm:$0xff]  ;;  %v737_v1 = vld [vmem:[%s6609_s14 + $0x8] sm:$0xff]  ;;  %v738_v2 = vld [vmem:[%s6609_s14 + $0x10] sm:$0xff] }
  0x9d   : > { %752 = vst [vmem:[#allocation2 + $0x30] sm:$0xff] %v736_v0  ;;  %753 = vst [vmem:[#allocation2] sm:$0xff] %v737_v1  ;;  %v739_v3 = vld [vmem:[%s6609_s14 + $0x18] sm:$0xff]  ;;  %v740_v4 = vld [vmem:[%s6609_s14 + $0x20] sm:$0xff] }
  0x9e   : > { %754 = vst [vmem:[#allocation2 + $0x58] sm:$0xff] %v738_v2  ;;  %v741_v5 = vld [vmem:[%s6609_s14 + $0x28] sm:$0xff]  ;;  %755 = vst [vmem:[#allocation2 + $0x18] sm:$0xff] %v739_v3  ;;  %v742_v6 = vld [vmem:[%s6609_s14 + $0x30] sm:$0xff] }
  0x9f   : > { %756 = vst [vmem:[#allocation2 + $0x50] sm:$0xff] %v740_v4  ;;  %757 = vst [vmem:[#allocation2 + $0x68] sm:$0xff] %v741_v5  ;;  %v743_v7 = vld [vmem:[%s6609_s14 + $0x38] sm:$0xff]  ;;  %v744_v8 = vld [vmem:[%s6609_s14 + $0x40] sm:$0xff] }
  0xa0   : > { %758 = vst [vmem:[#allocation2 + $0x8] sm:$0xff] %v742_v6  ;;  %759 = vst [vmem:[#allocation2 + $0x48] sm:$0xff] %v743_v7  ;;  %v745_v9 = vld [vmem:[%s6609_s14 + $0x48] sm:$0xff]  ;;  %v746_v10 = vld [vmem:[%s6609_s14 + $0x50] sm:$0xff] }
  0xa1   : > { %760 = vst [vmem:[#allocation2 + $0x40] sm:$0xff] %v744_v8  ;;  %v747_v11 = vld [vmem:[%s6609_s14 + $0x58] sm:$0xff]  ;;  %761 = vst [vmem:[#allocation2 + $0x20] sm:$0xff] %v745_v9  ;;  %v748_v12 = vld [vmem:[%s6609_s14 + $0x60] sm:$0xff] }
  0xa2   : > { %762 = vst [vmem:[#allocation2 + $0x10] sm:$0xff] %v746_v10  ;;  %763 = vst [vmem:[#allocation2 + $0x38] sm:$0xff] %v747_v11  ;;  %v749_v13 = vld [vmem:[%s6609_s14 + $0x68] sm:$0xff]  ;;  %v750_v14 = vld [vmem:[%s6609_s14 + $0x70] sm:$0xff] }
  0xa3   : > { %764 = vst [vmem:[#allocation2 + $0x60] sm:$0xff] %v748_v12  ;;  %765 = vst [vmem:[#allocation2 + $0x70] sm:$0xff] %v749_v13  ;;  %v751_v15 = vld [vmem:[%s6609_s14 + $0x78] sm:$0xff] }
  0xa4   : > { %766 = vst [vmem:[#allocation2 + $0x78] sm:$0xff] %v750_v14  ;;  %767 = vst [vmem:[#allocation2 + $0x28] sm:$0xff] %v751_v15 }
  0xa5 PF: > { %v1084_v16 = vld [vmem:[%s5726_s13] sm:$0x3]  ;;  %vm1189_vm0 = vcmask 1041408   ;;  %s6610_s9 = sld [smem:[#allocation26_spill]]  ;;  %vm1092_vm1 = vcmask 15360   ;;  %v5073_v26 = vld [vmem:[%s5734_s24 + $0x30] sm:$0xff]  }
  0xa6   : > { %4643 = vmatprep.subr.msk.mxu1 %vm1189_vm0, %v1084_v16  ;;  %v5072_v25 = vld [vmem:[%s5734_s24 + $0x38] sm:$0xff]   ;;  %v5074_v28 = vld [vmem:[%s5734_s24 + $0x28] sm:$0xff]   ;;  %v5075_v31 = vld [vmem:[%s5734_s24 + $0x20] sm:$0xff]   ;;  %vm1580_vm2 = vcmask 1043456   ;;  %s6611_s20 = sld [smem:[#allocation27_spill]]  ;;  %vm1483_vm3 = vcmask 31744  }
  0xa7   : > { %4644 = vmatpush3.msk.msra.mxu1 %vm1189_vm0, %v1084_v16  ;;  %4611 = vmatprep.subr.bf16.mxu0 %v5072_v25  ;;  %v771_v32 = vld [vmem:[#allocation2 + $0x30] sm:$0xff]  ;;  %v772_v33 = vld [vmem:[#allocation2] sm:$0xff]  ;;  %v5077_v41 = vld [vmem:[%s5734_s24 + $0x10] sm:$0xff]   ;;  %vm2463_vm4 = vcmask 1042432   ;;  %p3725_p13 = scmp.eq.s32.totalorder %s5464_s28, 2 }
  0xa8   : > { %4612 = vmatpush3.bf16.msra.mxu0 %v5072_v25  ;;  %v787_v35 = vpack.c.bf16 %v772_v33, %v771_v32  ;;  %v5076_v37 = vld [vmem:[%s5734_s24 + $0x18] sm:$0xff]   ;;  %v5078_v44 = vld [vmem:[%s5734_s24 + $0x8] sm:$0xff]   ;;  %v5079_v47 = vld [vmem:[%s5734_s24] sm:$0xff]  }
  0xa9   : > { %4613 = vmatprep.subr.bf16.mxu0 %v5073_v26  ;;  %v1809_v39 = vld [vmem:[%s5767_s12] sm:$0xf]  ;;  %v773_v50 = vld [vmem:[#allocation2 + $0x58] sm:$0xff]  ;;  %v775_v52 = vld [vmem:[#allocation2 + $0x50] sm:$0xff] }
  0xaa   : > { %4627 = vmatprep.mubr.bf16.mxu0 %v787_v35  ;;  %4743 = vmatprep.subr.msk.mxu1 %vm1580_vm2, %v1809_v39  ;;  %v774_v51 = vld [vmem:[#allocation2 + $0x18] sm:$0xff]  ;;  %v776_v53 = vld [vmem:[#allocation2 + $0x68] sm:$0xff]  ;;  %v779_v62 = vld [vmem:[#allocation2 + $0x40] sm:$0xff] }
  0xab   : > { %v1052_v17 = vld [vmem:[%s6610_s9] sm:$0xff]  ;;  %v1053_v18 = vld [vmem:[%s6610_s9 + $0x8] sm:$0xff]  ;;  %v1054_v19 = vld [vmem:[%s6610_s9 + $0x10] sm:$0xff]  ;;  %v788_v56 = vpack.c.bf16 %v774_v51, %v773_v50  ;;  %v789_v57 = vpack.c.bf16 %v776_v53, %v775_v52 }
  0xac   : > { %4645 = vmatprep.mubr.msk.f32.mxu1 %vm1092_vm1, %v1052_v17  ;;  %v1055_v20 = vld [vmem:[%s6610_s9 + $0x18] sm:$0xff]  ;;  %v1056_v21 = vld [vmem:[%s6610_s9 + $0x20] sm:$0xff]  ;;  %v1057_v22 = vld [vmem:[%s6610_s9 + $0x28] sm:$0xff]  ;;  %4614 = vmatpush3.bf16.msra.mxu0 %v5073_v26 }
  0xad   : > { %4646 = vmatmul.mubr.msk.f32.vlgmr.msra.gmra.mxu1 %vm1092_vm1, %v1053_v18  ;;  %v1058_v23 = vld [vmem:[%s6610_s9 + $0x30] sm:$0xff]  ;;  %v1059_v24 = vld [vmem:[%s6610_s9 + $0x38] sm:$0xff]  ;;  %v1060_v27 = vld [vmem:[%s6610_s9 + $0x40] sm:$0xff]  ;;  %4615 = vmatprep.subr.bf16.mxu0 %v5074_v28 }
  0xae   : > { %4648 = vmatprep.mubr.msk.f32.mxu1 %vm1092_vm1, %v1054_v19  ;;  %v1061_v29 = vld [vmem:[%s6610_s9 + $0x48] sm:$0xff]  ;;  %v1062_v30 = vld [vmem:[%s6610_s9 + $0x50] sm:$0xff]  ;;  %v1063_v34 = vld [vmem:[%s6610_s9 + $0x58] sm:$0xff]  ;;  %4744 = vmatpush3.msk.msra.mxu1 %vm1580_vm2, %v1809_v39  ;;  %v5482_v19 = vmov 0  }
  0xaf   : > { %v1064_v36 = vld [vmem:[%s6610_s9 + $0x60] sm:$0xff]  ;;  %v1065_v38 = vld [vmem:[%s6610_s9 + $0x68] sm:$0xff]  ;;  %v1066_v40 = vld [vmem:[%s6610_s9 + $0x70] sm:$0xff]  ;;  %5070 = vset.pattern.permute.xlu0 %v5482_v19  ;;  %5071 = vset.pattern.permute.xlu1 %v5482_v19 }
  0xb0   : > { %4616 = vmatpush3.bf16.msra.mxu0 %v5074_v28  ;;  %v1067_v42 = vld [vmem:[%s6610_s9 + $0x78] sm:$0xff]  ;;  %v1068_v43 = vld [vmem:[%s6610_s9 + $0x80] sm:$0xff]  ;;  %v1069_v45 = vld [vmem:[%s6610_s9 + $0x88] sm:$0xff] }
  0xb1   : > { %4649 = vmatmul.mubr.msk.f32.gmra.mxu1 %vm1092_vm1, %v1055_v20  ;;  %4617 = vmatprep.subr.bf16.mxu0 %v5075_v31  ;;  %v1070_v46 = vld [vmem:[%s6610_s9 + $0x90] sm:$0xff]  ;;  %v1071_v48 = vld [vmem:[%s6610_s9 + $0x98] sm:$0xff]  ;;  %v1072_v49 = vld [vmem:[%s6610_s9 + $0xa0] sm:$0xff] }
  0xb2   : > { %4651 = vmatprep.mubr.msk.f32.mxu1 %vm1092_vm1, %v1056_v21  ;;  %v1073_v54 = vld [vmem:[%s6610_s9 + $0xa8] sm:$0xff]  ;;  %v1074_v55 = vld [vmem:[%s6610_s9 + $0xb0] sm:$0xff]  ;;  %v1075_v58 = vld [vmem:[%s6610_s9 + $0xb8] sm:$0xff] }
  0xb3   : > { %v1076_v59 = vld [vmem:[%s6610_s9 + $0xc0] sm:$0xff]  ;;  %v777_v60 = vld [vmem:[#allocation2 + $0x8] sm:$0xff]  ;;  %v1078_v1 = vld [vmem:[%s6610_s9 + $0xd0] sm:$0xff] }
  0xb4   : > { %4618 = vmatpush3.bf16.msra.mxu0 %v5075_v31  ;;  %v778_v61 = vld [vmem:[#allocation2 + $0x48] sm:$0xff]  ;;  %v780_v63 = vld [vmem:[#allocation2 + $0x20] sm:$0xff]  ;;  %v1079_v4 = vld [vmem:[%s6610_s9 + $0xd8] sm:$0xff] }
  0xb5   : > { %4652 = vmatmul.mubr.msk.f32.gmra.mxu1 %vm1092_vm1, %v1057_v22  ;;  %4619 = vmatprep.subr.bf16.mxu0 %v5076_v37  ;;  %v1077_v0 = vld [vmem:[%s6610_s9 + $0xc8] sm:$0xff]  ;;  %v790_v2 = vpack.c.bf16 %v778_v61, %v777_v60  ;;  %v791_v3 = vpack.c.bf16 %v780_v63, %v779_v62  ;;  %v1080_v5 = vld [vmem:[%s6610_s9 + $0xe0] sm:$0xff]  ;;  %v781_v6 = vld [vmem:[#allocation2 + $0x10] sm:$0xff] }
  0xb6   : > { %4654 = vmatprep.mubr.msk.f32.mxu1 %vm1092_vm1, %v1058_v23  ;;  %v782_v7 = vld [vmem:[#allocation2 + $0x38] sm:$0xff]  ;;  %v783_v8 = vld [vmem:[#allocation2 + $0x60] sm:$0xff]  ;;  %v784_v9 = vld [vmem:[#allocation2 + $0x70] sm:$0xff] }
  0xb7   : > { %v1081_v10 = vld [vmem:[%s6610_s9 + $0xe8] sm:$0xff]  ;;  %v1082_v11 = vld [vmem:[%s6610_s9 + $0xf0] sm:$0xff]  ;;  %v792_v12 = vpack.c.bf16 %v782_v7, %v781_v6  ;;  %v793_v13 = vpack.c.bf16 %v784_v9, %v783_v8  ;;  %v1083_v14 = vld [vmem:[%s6610_s9 + $0xf8] sm:$0xff] }
  0xb8   : > { %4620 = vmatpush3.bf16.msra.mxu0 %v5076_v37  ;;  %v785_v15 = vld [vmem:[#allocation2 + $0x78] sm:$0xff]  ;;  %v786_v16 = vld [vmem:[#allocation2 + $0x28] sm:$0xff]  ;;  %v1482_v18 = vld [vmem:[%s5762_s1] sm:$0xf]  ;;  %s6612_s1 = scalar_lea.vmem %s6562_s5, %s5752_s19 }
  0xb9   : > { %4655 = vmatmul.mubr.msk.f32.gmra.mxu1 %vm1092_vm1, %v1059_v24  ;;  %4621 = vmatprep.subr.bf16.mxu0 %v5077_v41  ;;  %v794_v17 = vpack.c.bf16 %v786_v16, %v785_v15  ;;  %v2692_v20 = vld [vmem:[%s6611_s20] sm:$0xff]  ;;  %v2694_v21 = vld [vmem:[%s6611_s20 + $0x10] sm:$0xff]  ;;  %v2693_v22 = vld [vmem:[%s6611_s20 + $0x8] sm:$0xff] }
  0xba   : > { %4657 = vmatprep.mubr.msk.f32.mxu1 %vm1092_vm1, %v1060_v27  ;;  %2727 = vperm.xlu0 %5070, %v2692_v20   ;;  %v2695_v23 = vld [vmem:[%s6611_s20 + $0x18] sm:$0xff]  ;;  %v2697_v24 = vld [vmem:[%s6611_s20 + $0x28] sm:$0xff]  ;;  %v2696_v25 = vld [vmem:[%s6611_s20 + $0x20] sm:$0xff] }
  0xbb   : > { %2733 = vperm.xlu1 %5071, %v2694_v21   ;;  %v2699_v26 = vld [vmem:[%s6611_s20 + $0x38] sm:$0xff]  ;;  %v2698_v27 = vld [vmem:[%s6611_s20 + $0x30] sm:$0xff]  ;;  %v2701_v28 = vld [vmem:[%s6611_s20 + $0x48] sm:$0xff] }
  0xbc   : > { %4622 = vmatpush3.bf16.msra.mxu0 %v5077_v41  ;;  %v2702_v31 = vld [vmem:[%s6611_s20 + $0x50] sm:$0xff]  ;;  %v2705_v32 = vld [vmem:[%s6611_s20 + $0x68] sm:$0xff]  ;;  %v2704_v33 = vld [vmem:[%s6611_s20 + $0x60] sm:$0xff] }
  0xbd   : > { %4658 = vmatmul.mubr.msk.f32.gmra.mxu1 %vm1092_vm1, %v1061_v29  ;;  %4623 = vmatprep.subr.bf16.mxu0 %v5078_v44  ;;  %v2700_v29 = vld [vmem:[%s6611_s20 + $0x40] sm:$0xff]  ;;  %v2706_v35 = vld [vmem:[%s6611_s20 + $0x70] sm:$0xff]  ;;  %v2723_v50 = vld [vmem:[%s6611_s20 + $0xf8] sm:$0xff] }
  0xbe   : > { %4660 = vmatprep.mubr.msk.f32.mxu1 %vm1092_vm1, %v1062_v30  ;;  %2730 = vperm.xlu0 %5070, %v2693_v22   ;;  %v2703_v30 = vld [vmem:[%s6611_s20 + $0x58] sm:$0xff]  ;;  %v2708_v37 = vld [vmem:[%s6611_s20 + $0x80] sm:$0xff]  ;;  %v2710_v39 = vld [vmem:[%s6611_s20 + $0x90] sm:$0xff] }
  0xbf   : > { %2736 = vperm.xlu1 %5071, %v2695_v23   ;;  %v2712_v41 = vld [vmem:[%s6611_s20 + $0xa0] sm:$0xff]  ;;  %v2722_v51 = vld [vmem:[%s6611_s20 + $0xf0] sm:$0xff] }
  0xc0   : > { %4624 = vmatpush3.bf16.msra.mxu0 %v5078_v44  ;;  %v2717_v44 = vld [vmem:[%s6611_s20 + $0xc8] sm:$0xff]  ;;  %v6067_v52 = vld [vmem:[%s6612_s1] ss:$0 sm:$0xff] }
  0xc1   : > { %4661 = vmatmul.mubr.msk.f32.gmra.mxu1 %vm1092_vm1, %v1063_v34  ;;  %4625 = vmatprep.subr.bf16.mxu0 %v5079_v47  ;;  %v2707_v34 = vld [vmem:[%s6611_s20 + $0x78] sm:$0xff] }
  0xc2   : > { %4663 = vmatprep.mubr.msk.f32.mxu1 %vm1092_vm1, %v1064_v36  ;;  %2739 = vperm.xlu0 %5070, %v2696_v25   ;;  %v2709_v36 = vld [vmem:[%s6611_s20 + $0x88] sm:$0xff] }
  0xc3   : > { %2742 = vperm.xlu1 %5071, %v2697_v24  }
  0xc4   : > { %4626 = vmatpush3.bf16.msra.mxu0 %v5079_v47  ;;  %v2718_v47 = vld [vmem:[%s6611_s20 + $0xd0] sm:$0xff] }
  0xc5   : > { %4664 = vmatmul.mubr.msk.f32.gmra.mxu1 %vm1092_vm1, %v1065_v38  ;;  %4693 = vmatprep.subr.msk.mxu0 %vm1580_vm2, %v1482_v18  ;;  %v2711_v38 = vld [vmem:[%s6611_s20 + $0x98] sm:$0xff] }
  0xc6   : > { %4666 = vmatprep.mubr.msk.f32.mxu1 %vm1092_vm1, %v1066_v40  ;;  %2745 = vperm.xlu0 %5070, %v2698_v27   ;;  %v2713_v40 = vld [vmem:[%s6611_s20 + $0xa8] sm:$0xff] }
  0xc7   : > { %4628 = vmatmul.mubr.bf16.vlgmr.msra.gmra.mxu0 %v788_v56  ;;  %2748 = vperm.xlu1 %5071, %v2699_v26  }
  0xc8   : > { %4631 = vmatprep.mubr.bf16.mxu0 %v789_v57  ;;  %4694 = vmatpush3.msk.msra.mxu0 %vm1580_vm2, %v1482_v18 }
  0xc9   : > { %4667 = vmatmul.mubr.msk.f32.gmra.mxu1 %vm1092_vm1, %v1067_v42  ;;  %v2715_v42 = vld [vmem:[%s6611_s20 + $0xb8] sm:$0xff] }
  0xca   : > { %4669 = vmatprep.mubr.msk.f32.mxu1 %vm1092_vm1, %v1068_v43  ;;  %2751 = vperm.xlu0 %5070, %v2700_v29   ;;  %v2714_v43 = vld [vmem:[%s6611_s20 + $0xb0] sm:$0xff] }
  0xcb   : > { %2754 = vperm.xlu1 %5071, %v2701_v28  }
  0xcd   : > { %4670 = vmatmul.mubr.msk.f32.gmra.mxu1 %vm1092_vm1, %v1069_v45  ;;  %v2716_v45 = vld [vmem:[%s6611_s20 + $0xc0] sm:$0xff] }
  0xce   : > { %4672 = vmatprep.mubr.msk.f32.mxu1 %vm1092_vm1, %v1070_v46  ;;  %2757 = vperm.xlu0 %5070, %v2702_v31   ;;  %v2719_v46 = vld [vmem:[%s6611_s20 + $0xd8] sm:$0xff] }
  0xcf   : > { %4632 = vmatmul.mubr.bf16.gmra.mxu0 %v790_v2  ;;  %2760 = vperm.xlu1 %5071, %v2703_v30  }
  0xd0   : > { %4635 = vmatprep.mubr.bf16.mxu0 %v791_v3 }
  0xd1   : > { %4673 = vmatmul.mubr.msk.f32.gmra.mxu1 %vm1092_vm1, %v1071_v48  ;;  %v2721_v48 = vld [vmem:[%s6611_s20 + $0xe8] sm:$0xff] }
  0xd2   : > { %4675 = vmatprep.mubr.msk.f32.mxu1 %vm1092_vm1, %v1072_v49  ;;  %2763 = vperm.xlu0 %5070, %v2704_v33   ;;  %v2720_v49 = vld [vmem:[%s6611_s20 + $0xe0] sm:$0xff] }
  0xd3   : > { %2766 = vperm.xlu1 %5071, %v2705_v32  }
  0xd5   : > { %4676 = vmatmul.mubr.msk.f32.gmra.mxu1 %vm1092_vm1, %v1073_v54 }
  0xd6   : > { %4678 = vmatprep.mubr.msk.f32.mxu1 %vm1092_vm1, %v1074_v55  ;;  %2769 = vperm.xlu0 %5070, %v2706_v35  }
  0xd7   : > { %4636 = vmatmul.mubr.bf16.gmra.mxu0 %v792_v12  ;;  %2772 = vperm.xlu1 %5071, %v2707_v34  }
  0xd8   : > { %4639 = vmatprep.mubr.bf16.mxu0 %v793_v13 }
  0xd9   : > { %4679 = vmatmul.mubr.msk.f32.gmra.mxu1 %vm1092_vm1, %v1075_v58 }
  0xda   : > { %4681 = vmatprep.mubr.msk.f32.mxu1 %vm1092_vm1, %v1076_v59  ;;  %2775 = vperm.xlu0 %5070, %v2708_v37  }
  0xdb   : > { %2778 = vperm.xlu1 %5071, %v2709_v36  }
  0xdd   : > { %4682 = vmatmul.mubr.msk.f32.gmra.mxu1 %vm1092_vm1, %v1077_v0 }
  0xde   : > { %4684 = vmatprep.mubr.msk.f32.mxu1 %vm1092_vm1, %v1078_v1  ;;  %2781 = vperm.xlu0 %5070, %v2710_v39  }
  0xdf   : > { %4640 = vmatmul.mubr.bf16.gmra.mxu0 %v794_v17  ;;  %2784 = vperm.xlu1 %5071, %v2711_v38  }
  0xe1   : > { %4685 = vmatmul.mubr.msk.f32.gmra.mxu1 %vm1092_vm1, %v1079_v4 }
  0xe2   : > { %4687 = vmatprep.mubr.msk.f32.mxu1 %vm1092_vm1, %v1080_v5  ;;  %2787 = vperm.xlu0 %5070, %v2712_v41  }
  0xe3   : > { %2790 = vperm.xlu1 %5071, %v2713_v40  }
  0xe5   : > { %4688 = vmatmul.mubr.msk.f32.gmra.mxu1 %vm1092_vm1, %v1081_v10  ;;  %v2365_v10 = vld [vmem:[%s5743_s16] sm:$0x7]  ;;  %s6613_s16 = scalar_lea.vmem [#allocation10], %s5723_s3 }
  0xe6   : > { %4690 = vmatprep.mubr.msk.f32.mxu1 %vm1092_vm1, %v1082_v11  ;;  %2793 = vperm.xlu0 %5070, %v2714_v43  }
  0xe7   : > { %2796 = vperm.xlu1 %5071, %v2715_v42   ;;  %4793 = vmatprep.subr.msk.mxu0 %vm2463_vm4, %v2365_v10 }
  0xe9   : > { %4691 = vmatmul.mubr.msk.f32.gmra.mxu1 %vm1092_vm1, %v1083_v14 }
  0xea   : > { %2799 = vperm.xlu0 %5070, %v2716_v45  }
  0xeb   : > { %2802 = vperm.xlu1 %5071, %v2717_v44  }
  0xee   : > { %2805 = vperm.xlu0 %5070, %v2718_v47  }
  0xef   : > { %2808 = vperm.xlu1 %5071, %v2719_v46  }
  0xf2   : > { %2811 = vperm.xlu0 %5070, %v2720_v49  }
  0xf3   : > { %2814 = vperm.xlu1 %5071, %v2721_v48  }
  0xf6   : > { %2817 = vperm.xlu0 %5070, %v2722_v51  }
  0xf7   : > { %2820 = vperm.xlu1 %5071, %v2723_v50  }
 0x16d   : > { %v4647_v53 = vpop.f32.mrf.mxu1 }
 0x16e   : > { %v1265_v54 = vadd.f32 %v4647_v53, %v6067_v52 }
 0x16f   : > { %v1259_v55 = vpop.f32.mrf.mxu1 }
 0x170   : > { %v1260_v56 = vadd.f32 %v6067_v52, %v1259_v55  ;;  %5088 = vtanh.f32 %v1265_v54 }
 0x171   : > { %v4650_v57 = vpop.f32.mrf.mxu1 }
 0x172   : > { %5090 = vtanh.f32 %v1260_v56  ;;  %v1275_v58 = vadd.f32 %v4650_v57, %v6067_v52 }
 0x173   : > { %v1269_v59 = vpop.f32.mrf.mxu1 }
 0x174   : > { %v1270_v60 = vadd.f32 %v6067_v52, %v1269_v59  ;;  %5092 = vtanh.f32 %v1275_v58 }
 0x175   : > { %v4653_v61 = vpop.f32.mrf.mxu1 }
 0x176   : > { %5094 = vtanh.f32 %v1270_v60  ;;  %v1285_v62 = vadd.f32 %v4653_v61, %v6067_v52 }
 0x177   : > { %v1279_v63 = vpop.f32.mrf.mxu1 }
 0x178   : > { %v1280_v0 = vadd.f32 %v6067_v52, %v1279_v63  ;;  %5096 = vtanh.f32 %v1285_v62 }
 0x179   : > { %v4656_v1 = vpop.f32.mrf.mxu1 }
 0x17a   : > { %5098 = vtanh.f32 %v1280_v0  ;;  %v1295_v2 = vadd.f32 %v4656_v1, %v6067_v52 }
 0x17b   : > { %v1289_v3 = vpop.f32.mrf.mxu1 }
 0x17c   : > { %v1290_v4 = vadd.f32 %v6067_v52, %v1289_v3  ;;  %5100 = vtanh.f32 %v1295_v2 }
 0x17d   : > { %v4659_v5 = vpop.f32.mrf.mxu1  ;;  %v5089_v6 = vpop.eup %5088 }
 0x17e   : > { %5102 = vtanh.f32 %v1290_v4  ;;  %v1305_v7 = vadd.f32 %v4659_v5, %v6067_v52  ;;  %v1451_v13 = vmul.f32 %v5089_v6, %v5089_v6 }
 0x17f   : > { %v5091_v8 = vpop.eup %5090  ;;  %v1299_v9 = vpop.f32.mrf.mxu1 }
 0x180   : > { %v1300_v11 = vadd.f32 %v6067_v52, %v1299_v9  ;;  %4745 = vmatprep.mubr.msk.f32.mxu1 %vm1483_vm3, %v5091_v8  ;;  %v1450_v12 = vmul.f32 %v5091_v8, %v5091_v8  ;;  %5104 = vtanh.f32 %v1305_v7 }
 0x181   : > { %v4662_v14 = vpop.f32.mrf.mxu1  ;;  %4746 = vmatmul.mubr.msk.f32.vlgmr.msra.gmra.mxu1 %vm1483_vm3, %v5089_v6  ;;  %v5093_v15 = vpop.eup %5092 }
 0x182   : > { %5106 = vtanh.f32 %v1300_v11  ;;  %v1315_v16 = vadd.f32 %v4662_v14, %v6067_v52  ;;  %4695 = vmatprep.mubr.msk.f32.mxu0 %vm1483_vm3, %v1450_v12  ;;  %v1453_v22 = vmul.f32 %v5093_v15, %v5093_v15 }
 0x183   : > { %v5095_v17 = vpop.eup %5094  ;;  %v1309_v18 = vpop.f32.mrf.mxu1  ;;  %4696 = vmatmul.mubr.msk.f32.vlgmr.msra.gmra.mxu0 %vm1483_vm3, %v1451_v13 }
 0x184   : > { %v1310_v19 = vadd.f32 %v6067_v52, %v1309_v18  ;;  %4748 = vmatprep.mubr.msk.f32.mxu1 %vm1483_vm3, %v5095_v17  ;;  %v1452_v20 = vmul.f32 %v5095_v17, %v5095_v17  ;;  %4794 = vmatpush3.msk.msra.mxu0 %vm2463_vm4, %v2365_v10  ;;  %5108 = vtanh.f32 %v1315_v16 }
 0x185   : > { %v4665_v21 = vpop.f32.mrf.mxu1  ;;  %4749 = vmatmul.mubr.msk.f32.gmra.mxu1 %vm1483_vm3, %v5093_v15  ;;  %v5097_v23 = vpop.eup %5096 }
 0x186   : > { %5110 = vtanh.f32 %v1310_v19  ;;  %v1325_v24 = vadd.f32 %v4665_v21, %v6067_v52  ;;  %4698 = vmatprep.mubr.msk.f32.mxu0 %vm1483_vm3, %v1452_v20  ;;  %v1455_v30 = vmul.f32 %v5097_v23, %v5097_v23 }
 0x187   : > { %v5099_v25 = vpop.eup %5098  ;;  %v1319_v26 = vpop.f32.mrf.mxu1  ;;  %4699 = vmatmul.mubr.msk.f32.gmra.mxu0 %vm1483_vm3, %v1453_v22 }
 0x188   : > { %v1320_v27 = vadd.f32 %v6067_v52, %v1319_v26  ;;  %4751 = vmatprep.mubr.msk.f32.mxu1 %vm1483_vm3, %v5099_v25  ;;  %v1454_v28 = vmul.f32 %v5099_v25, %v5099_v25  ;;  %5112 = vtanh.f32 %v1325_v24  ;;  %v4629_v60 = vpop.f32.mrf.mxu0 }
 0x189   : > { %v4668_v29 = vpop.f32.mrf.mxu1  ;;  %4752 = vmatmul.mubr.msk.f32.gmra.mxu1 %vm1483_vm3, %v5097_v23  ;;  %v5101_v31 = vpop.eup %5100 }
 0x18a   : > { %5114 = vtanh.f32 %v1320_v27  ;;  %v1335_v32 = vadd.f32 %v4668_v29, %v6067_v52  ;;  %4701 = vmatprep.mubr.msk.f32.mxu0 %vm1483_vm3, %v1454_v28  ;;  %v1457_v38 = vmul.f32 %v5101_v31, %v5101_v31  ;;  %v893_v1 = vpop.f32.mrf.mxu0 }
 0x18b   : > { %v5103_v33 = vpop.eup %5102  ;;  %v1329_v34 = vpop.f32.mrf.mxu1  ;;  %4702 = vmatmul.mubr.msk.f32.gmra.mxu0 %vm1483_vm3, %v1455_v30 }
 0x18c   : > { %v1330_v35 = vadd.f32 %v6067_v52, %v1329_v34  ;;  %4754 = vmatprep.mubr.msk.f32.mxu1 %vm1483_vm3, %v5103_v33  ;;  %v1456_v36 = vmul.f32 %v5103_v33, %v5103_v33  ;;  %5116 = vtanh.f32 %v1335_v32  ;;  %v4630_v6 = vpop.f32.mrf.mxu0 }
 0x18d   : > { %v4671_v37 = vpop.f32.mrf.mxu1  ;;  %4755 = vmatmul.mubr.msk.f32.gmra.mxu1 %vm1483_vm3, %v5101_v31  ;;  %v5105_v39 = vpop.eup %5104  ;;  %v4288_v9 = vpack.c.bf16 %v4630_v6, %v4629_v60 }
 0x18e   : > { %5118 = vtanh.f32 %v1330_v35  ;;  %v1345_v40 = vadd.f32 %v4671_v37, %v6067_v52  ;;  %4704 = vmatprep.mubr.msk.f32.mxu0 %vm1483_vm3, %v1456_v36  ;;  %v1459_v46 = vmul.f32 %v5105_v39, %v5105_v39  ;;  %v896_v12 = vpop.f32.mrf.mxu0 }
 0x18f   : > { %v5107_v41 = vpop.eup %5106  ;;  %v1339_v42 = vpop.f32.mrf.mxu1  ;;  %4705 = vmatmul.mubr.msk.f32.gmra.mxu0 %vm1483_vm3, %v1457_v38  ;;  %4320 = vst [vmem:[#allocation3 + $0x8] sm:$0xff] %v4288_v9   ;;  %v4283_v15 = vpack.c.bf16 %v896_v12, %v893_v1 }
 0x190   : > { %v1340_v43 = vadd.f32 %v6067_v52, %v1339_v42  ;;  %4757 = vmatprep.mubr.msk.f32.mxu1 %vm1483_vm3, %v5107_v41  ;;  %v1458_v44 = vmul.f32 %v5107_v41, %v5107_v41  ;;  %5120 = vtanh.f32 %v1345_v40  ;;  %v4633_v18 = vpop.f32.mrf.mxu0 }
 0x191   : > { %v4674_v45 = vpop.f32.mrf.mxu1  ;;  %4758 = vmatmul.mubr.msk.f32.gmra.mxu1 %vm1483_vm3, %v5105_v39  ;;  %v5109_v47 = vpop.eup %5108  ;;  %4284 = vst [vmem:[#allocation3] sm:$0xff] %v4283_v15  }
 0x192   : > { %5122 = vtanh.f32 %v1340_v43  ;;  %v1355_v48 = vadd.f32 %v4674_v45, %v6067_v52  ;;  %4707 = vmatprep.mubr.msk.f32.mxu0 %vm1483_vm3, %v1458_v44  ;;  %v1461_v55 = vmul.f32 %v5109_v47, %v5109_v47  ;;  %v909_v23 = vpop.f32.mrf.mxu0 }
 0x193   : > { %v5111_v49 = vpop.eup %5110  ;;  %v1349_v50 = vpop.f32.mrf.mxu1  ;;  %4708 = vmatmul.mubr.msk.f32.gmra.mxu0 %vm1483_vm3, %v1459_v46 }
 0x194   : > { %v1350_v51 = vadd.f32 %v6067_v52, %v1349_v50  ;;  %4760 = vmatprep.mubr.msk.f32.mxu1 %vm1483_vm3, %v5111_v49  ;;  %v1460_v53 = vmul.f32 %v5111_v49, %v5111_v49  ;;  %5124 = vtanh.f32 %v1355_v48  ;;  %v4634_v28 = vpop.f32.mrf.mxu0 }
 0x195   : > { %v4677_v54 = vpop.f32.mrf.mxu1  ;;  %4761 = vmatmul.mubr.msk.f32.gmra.mxu1 %vm1483_vm3, %v5109_v47  ;;  %v5113_v56 = vpop.eup %5112  ;;  %v4298_v31 = vpack.c.bf16 %v4634_v28, %v4633_v18 }
 0x196   : > { %5126 = vtanh.f32 %v1350_v51  ;;  %v1365_v57 = vadd.f32 %v4677_v54, %v6067_v52  ;;  %4710 = vmatprep.mubr.msk.f32.mxu0 %vm1483_vm3, %v1460_v53  ;;  %v1463_v0 = vmul.f32 %v5113_v56, %v5113_v56  ;;  %v912_v34 = vpop.f32.mrf.mxu0 }
 0x197   : > { %v5115_v58 = vpop.eup %5114  ;;  %v1359_v59 = vpop.f32.mrf.mxu1  ;;  %4711 = vmatmul.mubr.msk.f32.gmra.mxu0 %vm1483_vm3, %v1461_v55  ;;  %4322 = vst [vmem:[#allocation3 + $0x18] sm:$0xff] %v4298_v31   ;;  %v4293_v37 = vpack.c.bf16 %v912_v34, %v909_v23  ;;  %v5086_v34 = vld [vmem:[#allocation3 + $0x8] sm:$0xff]  }
 0x198   : > { %v1360_v61 = vadd.f32 %v6067_v52, %v1359_v59  ;;  %4763 = vmatprep.mubr.msk.f32.mxu1 %vm1483_vm3, %v5115_v58  ;;  %v1462_v62 = vmul.f32 %v5115_v58, %v5115_v58  ;;  %5128 = vtanh.f32 %v1365_v57  ;;  %v4637_v40 = vpop.f32.mrf.mxu0 }
 0x199   : > { %v4680_v63 = vpop.f32.mrf.mxu1  ;;  %4764 = vmatmul.mubr.msk.f32.gmra.mxu1 %vm1483_vm3, %v5113_v56  ;;  %v5117_v2 = vpop.eup %5116  ;;  %4321 = vst [vmem:[#allocation3 + $0x10] sm:$0xff] %v4293_v37   ;;  %v5087_v37 = vld [vmem:[#allocation3] sm:$0xff]  }
 0x19a   : > { %5130 = vtanh.f32 %v1360_v61  ;;  %v1375_v3 = vadd.f32 %v4680_v63, %v6067_v52  ;;  %4713 = vmatprep.mubr.msk.f32.mxu0 %vm1483_vm3, %v1462_v62  ;;  %v1465_v11 = vmul.f32 %v5117_v2, %v5117_v2  ;;  %v925_v45 = vpop.f32.mrf.mxu0  ;;  %v2724_v62 = vlaneseq }
 0x19b   : > { %v5119_v4 = vpop.eup %5118  ;;  %v1369_v5 = vpop.f32.mrf.mxu1  ;;  %4714 = vmatmul.mubr.msk.f32.gmra.mxu0 %vm1483_vm3, %v1463_v0 }
 0x19c   : > { %v1370_v7 = vadd.f32 %v6067_v52, %v1369_v5  ;;  %4766 = vmatprep.mubr.msk.f32.mxu1 %vm1483_vm3, %v5119_v4  ;;  %v1464_v8 = vmul.f32 %v5119_v4, %v5119_v4  ;;  %5132 = vtanh.f32 %v1375_v3  ;;  %v4638_v50 = vpop.f32.mrf.mxu0  ;;  %v6158_v6 = vand.u32 127, %v2724_v62 }
 0x19d   : > { %v4683_v10 = vpop.f32.mrf.mxu1  ;;  %4767 = vmatmul.mubr.msk.f32.gmra.mxu1 %vm1483_vm3, %v5117_v2  ;;  %v5121_v13 = vpop.eup %5120  ;;  %v4308_v54 = vpack.c.bf16 %v4638_v50, %v4637_v40 }
 0x19e   : > { %5134 = vtanh.f32 %v1370_v7  ;;  %v1385_v14 = vadd.f32 %v4683_v10, %v6067_v52  ;;  %4716 = vmatprep.mubr.msk.f32.mxu0 %vm1483_vm3, %v1464_v8  ;;  %v1467_v22 = vmul.f32 %v5121_v13, %v5121_v13  ;;  %v928_v56 = vpop.f32.mrf.mxu0  ;;  %v6160_v7 = vpop.permute.xlu1 %2733 }
 0x19f   : > { %v5123_v16 = vpop.eup %5122  ;;  %v1379_v17 = vpop.f32.mrf.mxu1  ;;  %4717 = vmatmul.mubr.msk.f32.gmra.mxu0 %vm1483_vm3, %v1465_v11  ;;  %4324 = vst [vmem:[#allocation3 + $0x28] sm:$0xff] %v4308_v54   ;;  %v4303_v58 = vpack.c.bf16 %v928_v56, %v925_v45  ;;  %vm2824_vm8 = vcmp.eq.s32.totalorder %v6160_v7, %v6158_v6 }
 0x1a0   : > { %v1380_v19 = vadd.f32 %v6067_v52, %v1379_v17  ;;  %4769 = vmatprep.mubr.msk.f32.mxu1 %vm1483_vm3, %v5123_v16  ;;  %v1466_v20 = vmul.f32 %v5123_v16, %v5123_v16  ;;  %5136 = vtanh.f32 %v1385_v14  ;;  %v4641_v60 = vpop.f32.mrf.mxu0 }
 0x1a1   : > { %v4686_v21 = vpop.f32.mrf.mxu1  ;;  %4770 = vmatmul.mubr.msk.f32.gmra.mxu1 %vm1483_vm3, %v5121_v13  ;;  %v5125_v24 = vpop.eup %5124  ;;  %4323 = vst [vmem:[#allocation3 + $0x20] sm:$0xff] %v4303_v58  }
 0x1a2   : > { %5138 = vtanh.f32 %v1380_v19  ;;  %v1395_v25 = vadd.f32 %v4686_v21, %v6067_v52  ;;  %4719 = vmatprep.mubr.msk.f32.mxu0 %vm1483_vm3, %v1466_v20  ;;  %v1469_v33 = vmul.f32 %v5125_v24, %v5125_v24  ;;  %v941_v0 = vpop.f32.mrf.mxu0  ;;  %v2737_v17 = vpop.permute.xlu1 %2736 }
 0x1a3   : > { %v5127_v26 = vpop.eup %5126  ;;  %v1389_v27 = vpop.f32.mrf.mxu1  ;;  %4720 = vmatmul.mubr.msk.f32.gmra.mxu0 %vm1483_vm3, %v1467_v22  ;;  %v5483_v22 = vmov 1.0|1.0   ;;  %vm2825_vm9 = vcmp.eq.s32.totalorder %v2737_v17, %v6158_v6 }
 0x1a4   : > { %v1390_v29 = vadd.f32 %v6067_v52, %v1389_v27  ;;  %4772 = vmatprep.mubr.msk.f32.mxu1 %vm1483_vm3, %v5127_v26  ;;  %v1468_v30 = vmul.f32 %v5127_v26, %v5127_v26  ;;  %5140 = vtanh.f32 %v1395_v25  ;;  %v4642_v3 = vpop.f32.mrf.mxu0  ;;  %vm4192_vm12 = vmpackc.low %vm2825_vm9, %vm2824_vm8 }
 0x1a5   : > { %v4689_v32 = vpop.f32.mrf.mxu1  ;;  %4773 = vmatmul.mubr.msk.f32.gmra.mxu1 %vm1483_vm3, %v5125_v24  ;;  %v5129_v35 = vpop.eup %5128  ;;  %v4318_v5 = vpack.c.bf16 %v4642_v3, %v4641_v60 }
 0x1a6   : > { %5142 = vtanh.f32 %v1390_v29  ;;  %v1405_v36 = vadd.f32 %v4689_v32, %v6067_v52  ;;  %4722 = vmatprep.mubr.msk.f32.mxu0 %vm1483_vm3, %v1468_v30  ;;  %v1471_v44 = vmul.f32 %v5129_v35, %v5129_v35  ;;  %v944_v9 = vpop.f32.mrf.mxu0  ;;  %v2743_v24 = vpop.permute.xlu1 %2742  ;;  %v5082_v26 = vld [vmem:[#allocation3 + $0x28] sm:$0xff]   ;;  %v5084_v30 = vld [vmem:[#allocation3 + $0x18] sm:$0xff]  }
 0x1a7   : > { %v5131_v38 = vpop.eup %5130  ;;  %v1399_v39 = vpop.f32.mrf.mxu1  ;;  %4723 = vmatmul.mubr.msk.f32.gmra.mxu0 %vm1483_vm3, %v1469_v33  ;;  %4326 = vst [vmem:[#allocation3 + $0x38] sm:$0xff] %v4318_v5   ;;  %v4313_v12 = vpack.c.bf16 %v944_v9, %v941_v0  ;;  %v5085_v33 = vld [vmem:[#allocation3 + $0x10] sm:$0xff]   ;;  %vm2827_vm10 = vcmp.eq.s32.totalorder %v2743_v24, %v6158_v6 }
 0x1a8   : > { %v1400_v41 = vadd.f32 %v6067_v52, %v1399_v39  ;;  %4775 = vmatprep.mubr.msk.f32.mxu1 %vm1483_vm3, %v5131_v38  ;;  %v1470_v42 = vmul.f32 %v5131_v38, %v5131_v38  ;;  %5144 = vtanh.f32 %v1405_v36  ;;  %v5083_v27 = vld [vmem:[#allocation3 + $0x20] sm:$0xff]  }
 0x1a9   : > { %v4692_v43 = vpop.f32.mrf.mxu1  ;;  %4776 = vmatmul.mubr.msk.f32.gmra.mxu1 %vm1483_vm3, %v5129_v35  ;;  %v5133_v46 = vpop.eup %5132  ;;  %4325 = vst [vmem:[#allocation3 + $0x30] sm:$0xff] %v4313_v12  }
 0x1aa   : > { %5146 = vtanh.f32 %v1400_v41  ;;  %v1415_v47 = vadd.f32 %v4692_v43, %v6067_v52  ;;  %4725 = vmatprep.mubr.msk.f32.mxu0 %vm1483_vm3, %v1470_v42  ;;  %v1473_v55 = vmul.f32 %v5133_v46, %v5133_v46  ;;  %v2749_v28 = vpop.permute.xlu1 %2748 }
 0x1ab   : > { %v5135_v48 = vpop.eup %5134  ;;  %v1409_v49 = vpop.f32.mrf.mxu1  ;;  %4726 = vmatmul.mubr.msk.f32.gmra.mxu0 %vm1483_vm3, %v1471_v44  ;;  %vm2829_vm14 = vcmp.eq.s32.totalorder %v2749_v28, %v6158_v6 }
 0x1ac   : > { %v1410_v51 = vadd.f32 %v6067_v52, %v1409_v49  ;;  %4778 = vmatprep.mubr.msk.f32.mxu1 %vm1483_vm3, %v5135_v48  ;;  %v1472_v53 = vmul.f32 %v5135_v48, %v5135_v48  ;;  %5148 = vtanh.f32 %v1415_v47  ;;  %v2728_v52 = vpop.permute.xlu0 %2727 }
 0x1ad   : > { %4779 = vmatmul.mubr.msk.f32.gmra.mxu1 %vm1483_vm3, %v5133_v46  ;;  %v5137_v57 = vpop.eup %5136  ;;  %vm2822_vm5 = vcmp.eq.s32.totalorder %v2728_v52, %v6158_v6 }
 0x1ae   : > { %5150 = vtanh.f32 %v1410_v51  ;;  %4728 = vmatprep.mubr.msk.f32.mxu0 %vm1483_vm3, %v1472_v53  ;;  %v1475_v63 = vmul.f32 %v5137_v57, %v5137_v57  ;;  %v5080_v21 = vld [vmem:[#allocation3 + $0x38] sm:$0xff]   ;;  %v2755_v31 = vpop.permute.xlu1 %2754 }
 0x1af   : > { %v5139_v59 = vpop.eup %5138  ;;  %4729 = vmatmul.mubr.msk.f32.gmra.mxu0 %vm1483_vm3, %v1473_v55  ;;  %4843 = vmatprep.subr.bf16.mxu1 %v5080_v21  ;;  %vm2831_vm0 = vcmp.eq.s32.totalorder %v2755_v31, %v6158_v6 }
 0x1b0   : > { %4781 = vmatprep.mubr.msk.f32.mxu1 %vm1483_vm3, %v5139_v59  ;;  %v1474_v61 = vmul.f32 %v5139_v59, %v5139_v59  ;;  %v2731_v10 = vpop.permute.xlu0 %2730  ;;  %v5081_v23 = vld [vmem:[#allocation3 + $0x30] sm:$0xff]   ;;  %4844 = vmatpush3.bf16.msra.mxu1 %v5080_v21 }
 0x1b1   : > { %4782 = vmatmul.mubr.msk.f32.gmra.mxu1 %vm1483_vm3, %v5137_v57  ;;  %v5141_v1 = vpop.eup %5140  ;;  %vm2823_vm6 = vcmp.eq.s32.totalorder %v2731_v10, %v6158_v6  ;;  %4845 = vmatprep.subr.bf16.mxu1 %v5081_v23 }
 0x1b2   : > { %4731 = vmatprep.mubr.msk.f32.mxu0 %vm1483_vm3, %v1474_v61  ;;  %v1477_v8 = vmul.f32 %v5141_v1, %v5141_v1  ;;  %vm4190_vm7 = vmpackc.low %vm2823_vm6, %vm2822_vm5  ;;  %v2761_v35 = vpop.permute.xlu1 %2760  ;;  %v6224_v61 = vld [vmem:[%s6613_s16] ss:$0 sm:$0xff] }
 0x1b3   : > { %v5143_v2 = vpop.eup %5142  ;;  %4732 = vmatmul.mubr.msk.f32.gmra.mxu0 %vm1483_vm3, %v1475_v63  ;;  %vm2833_vm4 = vcmp.eq.s32.totalorder %v2761_v35, %v6158_v6 }
 0x1b4   : > { %4784 = vmatprep.mubr.msk.f32.mxu1 %vm1483_vm3, %v5143_v2  ;;  %v1476_v4 = vmul.f32 %v5143_v2, %v5143_v2  ;;  %v2740_v25 = vpop.permute.xlu0 %2739  ;;  %4846 = vmatpush3.bf16.msra.mxu1 %v5081_v23  ;;  %v6230_v23 = vld [vmem:[%s5773_s22 + $0x78] sm:$0xff] }
 0x1b5   : > { %4785 = vmatmul.mubr.msk.f32.gmra.mxu1 %vm1483_vm3, %v5141_v1  ;;  %v5145_v11 = vpop.eup %5144  ;;  %4847 = vmatprep.subr.bf16.mxu1 %v5082_v26  ;;  %vm2826_vm11 = vcmp.eq.s32.totalorder %v2740_v25, %v6158_v6 }
 0x1b6   : > { %4734 = vmatprep.mubr.msk.f32.mxu0 %vm1483_vm3, %v1476_v4  ;;  %v1479_v15 = vmul.f32 %v5145_v11, %v5145_v11  ;;  %v2767_v38 = vpop.permute.xlu1 %2766  ;;  %vm4194_vm13 = vmpackc.low %vm2827_vm10, %vm2826_vm11  ;;  %4891 = vmatprep.subr.mxu0 %v6230_v23 }
 0x1b7   : > { %v5147_v13 = vpop.eup %5146  ;;  %4735 = vmatmul.mubr.msk.f32.gmra.mxu0 %vm1483_vm3, %v1477_v8  ;;  %vm2835_vm6 = vcmp.eq.s32.totalorder %v2767_v38, %v6158_v6 }
 0x1b8   : > { %4787 = vmatprep.mubr.msk.f32.mxu1 %vm1483_vm3, %v5147_v13  ;;  %v1478_v14 = vmul.f32 %v5147_v13, %v5147_v13  ;;  %v2746_v29 = vpop.permute.xlu0 %2745  ;;  %4848 = vmatpush3.bf16.msra.mxu1 %v5082_v26 }
 0x1b9   : > { %4788 = vmatmul.mubr.msk.f32.gmra.mxu1 %vm1483_vm3, %v5145_v11  ;;  %v5149_v16 = vpop.eup %5148  ;;  %4849 = vmatprep.subr.bf16.mxu1 %v5083_v27  ;;  %vm2828_vm15 = vcmp.eq.s32.totalorder %v2746_v29, %v6158_v6 }
 0x1ba   : > { %4737 = vmatprep.mubr.msk.f32.mxu0 %vm1483_vm3, %v1478_v14  ;;  %v1481_v20 = vmul.f32 %v5149_v16, %v5149_v16  ;;  %v2773_v40 = vpop.permute.xlu1 %2772  ;;  %vm4196_vm2 = vmpackc.low %vm2829_vm14, %vm2828_vm15 }
 0x1bb   : > { %v5151_v18 = vpop.eup %5150  ;;  %4738 = vmatmul.mubr.msk.f32.gmra.mxu0 %vm1483_vm3, %v1479_v15  ;;  %vm2837_vm10 = vcmp.eq.s32.totalorder %v2773_v40, %v6158_v6 }
 0x1bc   : > { %4790 = vmatprep.mubr.msk.f32.mxu1 %vm1483_vm3, %v5151_v18  ;;  %v1480_v19 = vmul.f32 %v5151_v18, %v5151_v18  ;;  %4850 = vmatpush3.bf16.msra.mxu1 %v5083_v27  ;;  %v2752_v32 = vpop.permute.xlu0 %2751 }
 0x1bd   : > { %4791 = vmatmul.mubr.msk.f32.gmra.mxu1 %vm1483_vm3, %v5149_v16  ;;  %4851 = vmatprep.subr.bf16.mxu1 %v5084_v30  ;;  %vm2830_vm1 = vcmp.eq.s32.totalorder %v2752_v32, %v6158_v6 }
 0x1be   : > { %4740 = vmatprep.mubr.msk.f32.mxu0 %vm1483_vm3, %v1480_v19  ;;  %4859 = vmatprep.mubr.msk.bf16.mxu1 %vm4190_vm7, %v5483_v22  ;;  %v2779_v42 = vpop.permute.xlu1 %2778 }
 0x1bf   : > { %4741 = vmatmul.mubr.msk.f32.gmra.mxu0 %vm1483_vm3, %v1481_v20  ;;  %vm4198_vm3 = vmpackc.low %vm2831_vm0, %vm2830_vm1 }
 0x1c0   : > { %4852 = vmatpush3.bf16.msra.mxu1 %v5084_v30  ;;  %v2758_v36 = vpop.permute.xlu0 %2757 }
 0x1c1   : > { %4853 = vmatprep.subr.bf16.mxu1 %v5085_v33  ;;  %vm2832_vm5 = vcmp.eq.s32.totalorder %v2758_v36, %v6158_v6 }
 0x1c2   : > { %v2785_v44 = vpop.permute.xlu1 %2784  ;;  %vm4200_vm8 = vmpackc.low %vm2833_vm4, %vm2832_vm5 }
 0x1c3   : > { %vm2841_vm0 = vcmp.eq.s32.totalorder %v2785_v44, %v6158_v6 }
 0x1c4   : > { %4854 = vmatpush3.bf16.msra.mxu1 %v5085_v33  ;;  %v2764_v39 = vpop.permute.xlu0 %2763 }
 0x1c5   : > { %4855 = vmatprep.subr.bf16.mxu1 %v5086_v34  ;;  %vm2834_vm7 = vcmp.eq.s32.totalorder %v2764_v39, %v6158_v6 }
 0x1c6   : > { %vm4202_vm9 = vmpackc.low %vm2835_vm6, %vm2834_vm7  ;;  %v2791_v46 = vpop.permute.xlu1 %2790 }
 0x1c8   : > { %4856 = vmatpush3.bf16.msra.mxu1 %v5086_v34  ;;  %v2770_v41 = vpop.permute.xlu0 %2769 }
 0x1c9   : > { %4857 = vmatprep.subr.bf16.mxu1 %v5087_v37  ;;  %vm2836_vm11 = vcmp.eq.s32.totalorder %v2770_v41, %v6158_v6 }
 0x1ca   : > { %vm4204_vm14 = vmpackc.low %vm2837_vm10, %vm2836_vm11  ;;  %v2797_v48 = vpop.permute.xlu1 %2796 }
 0x1cb   : > { %vm2845_vm6 = vcmp.eq.s32.totalorder %v2797_v48, %v6158_v6 }
 0x1cc   : > { %4858 = vmatpush3.bf16.msra.mxu1 %v5087_v37  ;;  %v2776_v43 = vpop.permute.xlu0 %2775 }
 0x1ce   : > { %v2803_v50 = vpop.permute.xlu1 %2802 }
 0x1cf   : > { %4860 = vmatmul.mubr.msk.bf16.vlgmr.msra.gmra.mxu1 %vm4192_vm12, %v5483_v22  ;;  %vm2839_vm12 = vcmp.eq.s32.totalorder %v2779_v42, %v6158_v6 }
 0x1d0   : > { %4863 = vmatprep.mubr.msk.bf16.mxu1 %vm4194_vm13, %v5483_v22  ;;  %v2782_v45 = vpop.permute.xlu0 %2781  ;;  %vm2838_vm13 = vcmp.eq.s32.totalorder %v2776_v43, %v6158_v6 }
 0x1d1   : > { %vm4206_vm15 = vmpackc.low %vm2839_vm12, %vm2838_vm13  ;;  %vm2840_vm1 = vcmp.eq.s32.totalorder %v2782_v45, %v6158_v6 }
 0x1d2   : > { %vm4208_vm4 = vmpackc.low %vm2841_vm0, %vm2840_vm1  ;;  %v2809_v53 = vpop.permute.xlu1 %2808 }
 0x1d3   : > { %vm2849_vm12 = vcmp.eq.s32.totalorder %v2809_v53, %v6158_v6 }
 0x1d4   : > { %v2788_v47 = vpop.permute.xlu0 %2787 }
 0x1d6   : > { %v2815_v55 = vpop.permute.xlu1 %2814 }
 0x1d7   : > { %4864 = vmatmul.mubr.msk.bf16.gmra.mxu1 %vm4196_vm2, %v5483_v22  ;;  %vm2843_vm2 = vcmp.eq.s32.totalorder %v2791_v46, %v6158_v6 }
 0x1d8   : > { %4867 = vmatprep.mubr.msk.bf16.mxu1 %vm4198_vm3, %v5483_v22  ;;  %v2794_v49 = vpop.permute.xlu0 %2793  ;;  %vm2842_vm3 = vcmp.eq.s32.totalorder %v2788_v47, %v6158_v6 }
 0x1d9   : > { %vm4210_vm5 = vmpackc.low %vm2843_vm2, %vm2842_vm3  ;;  %vm2844_vm7 = vcmp.eq.s32.totalorder %v2794_v49, %v6158_v6 }
 0x1da   : > { %vm4212_vm10 = vmpackc.low %vm2845_vm6, %vm2844_vm7  ;;  %v2821_v57 = vpop.permute.xlu1 %2820 }
 0x1db   : > { %vm2853_vm2 = vcmp.eq.s32.totalorder %v2821_v57, %v6158_v6 }
 0x1dc   : > { %v2800_v51 = vpop.permute.xlu0 %2799 }
 0x1df   : > { %4868 = vmatmul.mubr.msk.bf16.gmra.mxu1 %vm4200_vm8, %v5483_v22  ;;  %vm2847_vm8 = vcmp.eq.s32.totalorder %v2803_v50, %v6158_v6 }
 0x1e0   : > { %4871 = vmatprep.mubr.msk.bf16.mxu1 %vm4202_vm9, %v5483_v22  ;;  %vm2846_vm9 = vcmp.eq.s32.totalorder %v2800_v51, %v6158_v6  ;;  %v2806_v54 = vpop.permute.xlu0 %2805 }
 0x1e1   : > { %vm4214_vm11 = vmpackc.low %vm2847_vm8, %vm2846_vm9  ;;  %vm2848_vm13 = vcmp.eq.s32.totalorder %v2806_v54, %v6158_v6 }
 0x1e2   : > { %vm4216_vm0 = vmpackc.low %vm2849_vm12, %vm2848_vm13 }
 0x1e4   : > { %v2812_v56 = vpop.permute.xlu0 %2811 }
 0x1e7   : > { %4872 = vmatmul.mubr.msk.bf16.gmra.mxu1 %vm4204_vm14, %v5483_v22  ;;  %vm2851_vm14 = vcmp.eq.s32.totalorder %v2815_v55, %v6158_v6 }
 0x1e8   : > { %4875 = vmatprep.mubr.msk.bf16.mxu1 %vm4206_vm15, %v5483_v22  ;;  %vm2850_vm15 = vcmp.eq.s32.totalorder %v2812_v56, %v6158_v6  ;;  %v2818_v58 = vpop.permute.xlu0 %2817 }
 0x1e9   : > { %vm4218_vm1 = vmpackc.low %vm2851_vm14, %vm2850_vm15  ;;  %vm2852_vm3 = vcmp.eq.s32.totalorder %v2818_v58, %v6158_v6 }
 0x1ef   : > { %4876 = vmatmul.mubr.msk.bf16.gmra.mxu1 %vm4208_vm4, %v5483_v22  ;;  %vm4220_vm4 = vmpackc.low %vm2853_vm2, %vm2852_vm3 }
 0x1f0   : > { %4879 = vmatprep.mubr.msk.bf16.mxu1 %vm4210_vm5, %v5483_v22  ;;  %vm2366_vm5 = vcmask 23552  }
 0x1f7   : > { %4880 = vmatmul.mubr.msk.bf16.gmra.mxu1 %vm4212_vm10, %v5483_v22 }
 0x1f8   : > { %4883 = vmatprep.mubr.msk.bf16.mxu1 %vm4214_vm11, %v5483_v22 }
 0x1ff   : > { %4884 = vmatmul.mubr.msk.bf16.gmra.mxu1 %vm4216_vm0, %v5483_v22 }
 0x200   : > { %4887 = vmatprep.mubr.msk.bf16.mxu1 %vm4218_vm1, %v5483_v22 }
 0x207   : > { %4888 = vmatmul.mubr.msk.bf16.gmra.mxu1 %vm4220_vm4, %v5483_v22 }
 0x241   : > { %v4747_v59 = vpop.f32.mrf.mxu1 }
 0x242   : > { %v2135_v60 = vmul.f32 2.0, %v4747_v59 }
 0x243   : > { %v4697_v52 = vpop.f32.mrf.mxu0  ;;  %v1975_v63 = vpop.f32.mrf.mxu1 }
 0x244   : > { %v2167_v0 = vsub.f32 %v4697_v52, %v2135_v60  ;;  %v2134_v1 = vmul.f32 2.0, %v1975_v63 }
 0x245   : > { %v1650_v2 = vpop.f32.mrf.mxu0  ;;  %v4750_v3 = vpop.f32.mrf.mxu1 }
 0x246   : > { %v2206_v4 = vadd.f32 %v6224_v61, %v2167_v0  ;;  %v2166_v5 = vsub.f32 %v1650_v2, %v2134_v1  ;;  %v2137_v7 = vmul.f32 2.0, %v4750_v3 }
 0x247   : > { %v4700_v6 = vpop.f32.mrf.mxu0  ;;  %v1985_v8 = vpop.f32.mrf.mxu1 }
 0x248   : > { %v2238_v9 = vmul.f32 -0.5, %v2206_v4  ;;  %v2205_v10 = vadd.f32 %v6224_v61, %v2166_v5  ;;  %v2169_v11 = vsub.f32 %v4700_v6, %v2137_v7  ;;  %v2136_v12 = vmul.f32 2.0, %v1985_v8 }
 0x249   : > { %v1660_v13 = vpop.f32.mrf.mxu0  ;;  %v4753_v14 = vpop.f32.mrf.mxu1 }
 0x24a   : > { %v2270_v15 = vmin.f32 %v2238_v9, 0.0  ;;  %v2237_v16 = vmul.f32 -0.5, %v2205_v10  ;;  %v2208_v17 = vadd.f32 %v6224_v61, %v2169_v11  ;;  %v2168_v18 = vsub.f32 %v1660_v13, %v2136_v12 }
 0x24b   : > { %v2139_v19 = vmul.f32 2.0, %v4753_v14  ;;  %v4703_v20 = vpop.f32.mrf.mxu0  ;;  %v1995_v21 = vpop.f32.mrf.mxu1 }
 0x24c   : > { %v2303_v24 = vmul.f32 1.442695, %v2270_v15  ;;  %v2269_v25 = vmin.f32 %v2237_v16, 0.0  ;;  %v2240_v26 = vmul.f32 -0.5, %v2208_v17  ;;  %v2207_v27 = vadd.f32 %v6224_v61, %v2168_v18 }
 0x24d   : > { %v2171_v28 = vsub.f32 %v4703_v20, %v2139_v19  ;;  %v2138_v29 = vmul.f32 2.0, %v1995_v21  ;;  %v1670_v30 = vpop.f32.mrf.mxu0  ;;  %v4756_v31 = vpop.f32.mrf.mxu1 }
 0x24e   : > { %v2301_v32 = vmul.f32 1.442695, %v2269_v25  ;;  %v2272_v33 = vmin.f32 %v2240_v26, 0.0  ;;  %v2239_v34 = vmul.f32 -0.5, %v2207_v27  ;;  %5152 = vpow2.f32 %v2303_v24 }
 0x24f   : > { %v2210_v35 = vadd.f32 %v6224_v61, %v2171_v28  ;;  %v2170_v36 = vsub.f32 %v1670_v30, %v2138_v29  ;;  %v2141_v37 = vmul.f32 2.0, %v4756_v31  ;;  %v4706_v38 = vpop.f32.mrf.mxu0  ;;  %v2005_v39 = vpop.f32.mrf.mxu1 }
 0x250   : > { %5154 = vpow2.f32 %v2301_v32  ;;  %v2271_v40 = vmin.f32 %v2239_v34, 0.0  ;;  %v2140_v41 = vmul.f32 2.0, %v2005_v39  ;;  %v2307_v42 = vmul.f32 1.442695, %v2272_v33 }
 0x251   : > { %v2242_v43 = vmul.f32 -0.5, %v2210_v35  ;;  %v2209_v44 = vadd.f32 %v6224_v61, %v2170_v36  ;;  %v2173_v45 = vsub.f32 %v4706_v38, %v2141_v37  ;;  %v1680_v46 = vpop.f32.mrf.mxu0  ;;  %v4759_v47 = vpop.f32.mrf.mxu1  ;;  %v3173_v37 = vld [vmem:[%s5773_s22 + $0x70] sm:$0xff] }
 0x252   : > { %v2305_v48 = vmul.f32 1.442695, %v2271_v40  ;;  %v2172_v49 = vsub.f32 %v1680_v46, %v2140_v41  ;;  %v2143_v50 = vmul.f32 2.0, %v4759_v47 }
 0x253   : > { %v2274_v51 = vmin.f32 %v2242_v43, 0.0  ;;  %v2241_v53 = vmul.f32 -0.5, %v2209_v44  ;;  %v2212_v54 = vadd.f32 %v6224_v61, %v2173_v45  ;;  %v4709_v55 = vpop.f32.mrf.mxu0  ;;  %v2015_v56 = vpop.f32.mrf.mxu1 }
 0x254   : > { %5156 = vpow2.f32 %v2305_v48  ;;  %v2211_v57 = vadd.f32 %v6224_v61, %v2172_v49  ;;  %v2175_v58 = vsub.f32 %v4709_v55, %v2143_v50  ;;  %v2142_v59 = vmul.f32 2.0, %v2015_v56  ;;  %v3172_v50 = vld [vmem:[%s5773_s22 + $0x68] sm:$0xff] }
 0x255   : > { %5158 = vpow2.f32 %v2307_v42  ;;  %v2311_v60 = vmul.f32 1.442695, %v2274_v51  ;;  %v2273_v52 = vmin.f32 %v2241_v53, 0.0  ;;  %v2244_v63 = vmul.f32 -0.5, %v2212_v54  ;;  %v1690_v0 = vpop.f32.mrf.mxu0  ;;  %v4762_v1 = vpop.f32.mrf.mxu1 }
 0x256   : > { %v2243_v2 = vmul.f32 -0.5, %v2211_v57  ;;  %v2214_v3 = vadd.f32 %v6224_v61, %v2175_v58  ;;  %v2174_v4 = vsub.f32 %v1690_v0, %v2142_v59  ;;  %v2145_v5 = vmul.f32 2.0, %v4762_v1 }
 0x257   : > { %5160 = vpow2.f32 %v2311_v60  ;;  %v2309_v7 = vmul.f32 1.442695, %v2273_v52  ;;  %v2276_v6 = vmin.f32 %v2244_v63, 0.0  ;;  %v4712_v8 = vpop.f32.mrf.mxu0  ;;  %v2025_v9 = vpop.f32.mrf.mxu1 }
 0x258   : > { %v2275_v10 = vmin.f32 %v2243_v2, 0.0  ;;  %v2246_v11 = vmul.f32 -0.5, %v2214_v3  ;;  %v2213_v12 = vadd.f32 %v6224_v61, %v2174_v4  ;;  %v2177_v13 = vsub.f32 %v4712_v8, %v2145_v5 }
 0x259   : > { %5162 = vpow2.f32 %v2309_v7  ;;  %v2315_v14 = vmul.f32 1.442695, %v2276_v6  ;;  %v2144_v15 = vmul.f32 2.0, %v2025_v9  ;;  %v1700_v16 = vpop.f32.mrf.mxu0  ;;  %v4765_v17 = vpop.f32.mrf.mxu1  ;;  %v3170_v9 = vld [vmem:[%s5773_s22 + $0x58] sm:$0xff] }
 0x25a   : > { %v2313_v18 = vmul.f32 1.442695, %v2275_v10  ;;  %v2278_v19 = vmin.f32 %v2246_v11, 0.0  ;;  %v2245_v20 = vmul.f32 -0.5, %v2213_v12  ;;  %v2216_v21 = vadd.f32 %v6224_v61, %v2177_v13 }
 0x25b   : > { %v2176_v24 = vsub.f32 %v1700_v16, %v2144_v15  ;;  %v2147_v25 = vmul.f32 2.0, %v4765_v17  ;;  %v4715_v26 = vpop.f32.mrf.mxu0  ;;  %v2035_v27 = vpop.f32.mrf.mxu1 }
 0x25c   : > { %v5153_v28 = vpop.eup %5152  ;;  %5164 = vpow2.f32 %v2313_v18  ;;  %v2277_v29 = vmin.f32 %v2245_v20, 0.0  ;;  %v2248_v30 = vmul.f32 -0.5, %v2216_v21  ;;  %v2146_v34 = vmul.f32 2.0, %v2035_v27 }
 0x25d   : > { %v5155_v31 = vpop.eup %5154  ;;  %5166 = vpow2.f32 %v2315_v14  ;;  %v2215_v32 = vadd.f32 %v6224_v61, %v2176_v24  ;;  %v2179_v33 = vsub.f32 %v4715_v26, %v2147_v25  ;;  %v1710_v35 = vpop.f32.mrf.mxu0  ;;  %v2319_v38 = vmul.f32 1.442695, %v2278_v19  ;;  %v3169_v25 = vld [vmem:[%s5773_s22 + $0x50] sm:$0xff] }
 0x25e   : > { %v4768_v36 = vpop.f32.mrf.mxu1  ;;  %v2317_v39 = vmul.f32 1.442695, %v2277_v29  ;;  %v2280_v40 = vmin.f32 %v2248_v30, 0.0  ;;  %4795 = vmatprep.mubr.msk.f32.mxu0 %vm2366_vm5, %v5155_v31  ;;  %v2178_v44 = vsub.f32 %v1710_v35, %v2146_v34  ;;  %v3168_v34 = vld [vmem:[%s5773_s22 + $0x48] sm:$0xff] }
 0x25f   : > { %v2149_v41 = vmul.f32 2.0, %v4768_v36  ;;  %v2247_v42 = vmul.f32 -0.5, %v2215_v32  ;;  %v2218_v43 = vadd.f32 %v6224_v61, %v2179_v33  ;;  %v4718_v45 = vpop.f32.mrf.mxu0  ;;  %4796 = vmatmul.mubr.msk.f32.vlgmr.msra.gmra.mxu0 %vm2366_vm5, %v5153_v28 }
 0x260   : > { %v2045_v46 = vpop.f32.mrf.mxu1  ;;  %5168 = vpow2.f32 %v2317_v39  ;;  %v2323_v47 = vmul.f32 1.442695, %v2280_v40  ;;  %4892 = vmatpush3.msra.mxu0 %v6230_v23  ;;  %v2217_v55 = vadd.f32 %v6224_v61, %v2178_v44  ;;  %v3171_v23 = vld [vmem:[%s5773_s22 + $0x60] sm:$0xff] }
 0x261   : > { %v2181_v48 = vsub.f32 %v4718_v45, %v2149_v41  ;;  %v2148_v49 = vmul.f32 2.0, %v2045_v46  ;;  %v5157_v51 = vpop.eup %5156  ;;  %v2279_v53 = vmin.f32 %v2247_v42, 0.0  ;;  %v2250_v54 = vmul.f32 -0.5, %v2218_v43  ;;  %v1720_v56 = vpop.f32.mrf.mxu0  ;;  %4893 = vmatprep.subr.mxu0 %v3173_v37  ;;  %v3167_v45 = vld [vmem:[%s5773_s22 + $0x40] sm:$0xff] }
 0x262   : > { %v4771_v57 = vpop.f32.mrf.mxu1  ;;  %v5159_v58 = vpop.eup %5158  ;;  %5170 = vpow2.f32 %v2319_v38  ;;  %4798 = vmatprep.mubr.msk.f32.mxu0 %vm2366_vm5, %v5157_v51  ;;  %4894 = vmatpush3.msra.mxu0 %v3173_v37  ;;  %v2249_v1 = vmul.f32 -0.5, %v2217_v55 }
 0x263   : > { %v2220_v59 = vadd.f32 %v6224_v61, %v2181_v48  ;;  %v2180_v60 = vsub.f32 %v1720_v56, %v2148_v49  ;;  %v2151_v52 = vmul.f32 2.0, %v4771_v57  ;;  %5172 = vpow2.f32 %v2323_v47  ;;  %v4721_v2 = vpop.f32.mrf.mxu0  ;;  %4799 = vmatmul.mubr.msk.f32.gmra.mxu0 %vm2366_vm5, %v5159_v58  ;;  %4895 = vmatprep.subr.mxu0 %v3172_v50  ;;  %v3166_v56 = vld [vmem:[%s5773_s22 + $0x38] sm:$0xff] }
 0x264   : > { %v2321_v63 = vmul.f32 1.442695, %v2279_v53  ;;  %v2282_v0 = vmin.f32 %v2250_v54, 0.0  ;;  %v2055_v3 = vpop.f32.mrf.mxu1  ;;  %v5161_v4 = vpop.eup %5160  ;;  %4896 = vmatpush3.msra.mxu0 %v3172_v50  ;;  %v2281_v11 = vmin.f32 %v2249_v1, 0.0 }
 0x265   : > { %v2252_v5 = vmul.f32 -0.5, %v2220_v59  ;;  %v2219_v7 = vadd.f32 %v6224_v61, %v2180_v60  ;;  %v2183_v6 = vsub.f32 %v4721_v2, %v2151_v52  ;;  %v2150_v8 = vmul.f32 2.0, %v2055_v3  ;;  %v1730_v12 = vpop.f32.mrf.mxu0  ;;  %4897 = vmatprep.subr.mxu0 %v3171_v23  ;;  %v3165_v2 = vld [vmem:[%s5773_s22 + $0x30] sm:$0xff] }
 0x266   : > { %5174 = vpow2.f32 %v2321_v63  ;;  %v2327_v10 = vmul.f32 1.442695, %v2282_v0  ;;  %v4774_v13 = vpop.f32.mrf.mxu1  ;;  %v5163_v14 = vpop.eup %5162  ;;  %4898 = vmatpush3.msra.mxu0 %v3171_v23  ;;  %v2325_v19 = vmul.f32 1.442695, %v2281_v11 }
 0x267   : > { %v2284_v15 = vmin.f32 %v2252_v5, 0.0  ;;  %v2251_v16 = vmul.f32 -0.5, %v2219_v7  ;;  %v2222_v17 = vadd.f32 %v6224_v61, %v2183_v6  ;;  %v2182_v18 = vsub.f32 %v1730_v12, %v2150_v8  ;;  %4801 = vmatprep.mubr.msk.f32.mxu0 %vm2366_vm5, %v5163_v14  ;;  %v4724_v21 = vpop.f32.mrf.mxu0  ;;  %4899 = vmatprep.subr.mxu0 %v3170_v9  ;;  %v3164_v12 = vld [vmem:[%s5773_s22 + $0x28] sm:$0xff] }
 0x268   : > { %v2153_v20 = vmul.f32 2.0, %v4774_v13  ;;  %v2065_v24 = vpop.f32.mrf.mxu1  ;;  %5176 = vpow2.f32 %v2327_v10  ;;  %4802 = vmatmul.mubr.msk.f32.gmra.mxu0 %vm2366_vm5, %v5161_v4 }
 0x269   : > { %v2283_v26 = vmin.f32 %v2251_v16, 0.0  ;;  %v2254_v27 = vmul.f32 -0.5, %v2222_v17  ;;  %v2221_v28 = vadd.f32 %v6224_v61, %v2182_v18  ;;  %v5165_v29 = vpop.eup %5164  ;;  %5178 = vpow2.f32 %v2325_v19  ;;  %v1740_v32 = vpop.f32.mrf.mxu0  ;;  %4900 = vmatpush3.msra.mxu0 %v3170_v9 }
 0x26a   : > { %v2185_v30 = vsub.f32 %v4724_v21, %v2153_v20  ;;  %v2152_v31 = vmul.f32 2.0, %v2065_v24  ;;  %v4777_v33 = vpop.f32.mrf.mxu1  ;;  %v5167_v35 = vpop.eup %5166  ;;  %v2331_v36 = vmul.f32 1.442695, %v2284_v15  ;;  %4804 = vmatprep.mubr.msk.f32.mxu0 %vm2366_vm5, %v5165_v29  ;;  %4901 = vmatprep.subr.mxu0 %v3169_v25  ;;  %v3163_v24 = vld [vmem:[%s5773_s22 + $0x20] sm:$0xff] }
 0x26b   : > { %v2329_v37 = vmul.f32 1.442695, %v2283_v26  ;;  %v2286_v38 = vmin.f32 %v2254_v27, 0.0  ;;  %v2253_v39 = vmul.f32 -0.5, %v2221_v28  ;;  %v2155_v42 = vmul.f32 2.0, %v4777_v33  ;;  %v4727_v43 = vpop.f32.mrf.mxu0  ;;  %4902 = vmatpush3.msra.mxu0 %v3169_v25 }
 0x26c   : > { %v2224_v40 = vadd.f32 %v6224_v61, %v2185_v30  ;;  %v2184_v41 = vsub.f32 %v1740_v32, %v2152_v31  ;;  %v2075_v44 = vpop.f32.mrf.mxu1  ;;  %4805 = vmatmul.mubr.msk.f32.gmra.mxu0 %vm2366_vm5, %v5167_v35  ;;  %4903 = vmatprep.subr.mxu0 %v3168_v34 }
 0x26d   : > { %5180 = vpow2.f32 %v2329_v37  ;;  %v2285_v46 = vmin.f32 %v2253_v39, 0.0  ;;  %v2154_v47 = vmul.f32 2.0, %v2075_v44  ;;  %v5169_v48 = vpop.eup %5168  ;;  %v2335_v49 = vmul.f32 1.442695, %v2286_v38  ;;  %v1750_v54 = vpop.f32.mrf.mxu0  ;;  %4904 = vmatpush3.msra.mxu0 %v3168_v34  ;;  %v3162_v34 = vld [vmem:[%s5773_s22 + $0x18] sm:$0xff] }
 0x26e   : > { %v2256_v50 = vmul.f32 -0.5, %v2224_v40  ;;  %v2223_v51 = vadd.f32 %v6224_v61, %v2184_v41  ;;  %v2187_v53 = vsub.f32 %v4727_v43, %v2155_v42  ;;  %v4780_v55 = vpop.f32.mrf.mxu1  ;;  %5182 = vpow2.f32 %v2331_v36  ;;  %4807 = vmatprep.mubr.msk.f32.mxu0 %vm2366_vm5, %v5169_v48  ;;  %4905 = vmatprep.subr.mxu0 %v3167_v45 }
 0x26f   : > { %v2333_v57 = vmul.f32 1.442695, %v2285_v46  ;;  %v2186_v58 = vsub.f32 %v1750_v54, %v2154_v47  ;;  %v2157_v59 = vmul.f32 2.0, %v4780_v55  ;;  %v5171_v60 = vpop.eup %5170  ;;  %v4730_v0 = vpop.f32.mrf.mxu0  ;;  %4906 = vmatpush3.msra.mxu0 %v3167_v45 }
 0x270   : > { %v2288_v52 = vmin.f32 %v2256_v50, 0.0  ;;  %v2255_v23 = vmul.f32 -0.5, %v2223_v51  ;;  %v2226_v63 = vadd.f32 %v6224_v61, %v2187_v53  ;;  %v2085_v1 = vpop.f32.mrf.mxu1  ;;  %v5173_v3 = vpop.eup %5172  ;;  %4808 = vmatmul.mubr.msk.f32.gmra.mxu0 %vm2366_vm5, %v5171_v60  ;;  %4907 = vmatprep.subr.mxu0 %v3166_v56 }
 0x271   : > { %5184 = vpow2.f32 %v2333_v57  ;;  %v2225_v4 = vadd.f32 %v6224_v61, %v2186_v58  ;;  %v2189_v5 = vsub.f32 %v4730_v0, %v2157_v59  ;;  %v2156_v7 = vmul.f32 2.0, %v2085_v1  ;;  %v1760_v10 = vpop.f32.mrf.mxu0  ;;  %4908 = vmatpush3.msra.mxu0 %v3166_v56 }
 0x272   : > { %5186 = vpow2.f32 %v2335_v49  ;;  %v2339_v6 = vmul.f32 1.442695, %v2288_v52  ;;  %v2287_v8 = vmin.f32 %v2255_v23, 0.0  ;;  %v2258_v9 = vmul.f32 -0.5, %v2226_v63  ;;  %v4783_v11 = vpop.f32.mrf.mxu1  ;;  %4909 = vmatprep.subr.mxu0 %v3165_v2 }
 0x273   : > { %v5175_v13 = vpop.eup %5174  ;;  %v2257_v14 = vmul.f32 -0.5, %v2225_v4  ;;  %v2228_v15 = vadd.f32 %v6224_v61, %v2189_v5  ;;  %v2188_v16 = vsub.f32 %v1760_v10, %v2156_v7  ;;  %v2159_v17 = vmul.f32 2.0, %v4783_v11  ;;  %v4733_v20 = vpop.f32.mrf.mxu0  ;;  %4910 = vmatpush3.msra.mxu0 %v3165_v2 }
 0x274   : > { %5188 = vpow2.f32 %v2339_v6  ;;  %v2337_v18 = vmul.f32 1.442695, %v2287_v8  ;;  %v2290_v19 = vmin.f32 %v2258_v9, 0.0  ;;  %4810 = vmatprep.mubr.msk.f32.mxu0 %vm2366_vm5, %v5175_v13  ;;  %v2095_v21 = vpop.f32.mrf.mxu1  ;;  %4911 = vmatprep.subr.mxu0 %v3164_v12 }
 0x275   : > { %v2289_v25 = vmin.f32 %v2257_v14, 0.0  ;;  %v2260_v26 = vmul.f32 -0.5, %v2228_v15  ;;  %v2227_v27 = vadd.f32 %v6224_v61, %v2188_v16  ;;  %v2191_v28 = vsub.f32 %v4733_v20, %v2159_v17  ;;  %4811 = vmatmul.mubr.msk.f32.gmra.mxu0 %vm2366_vm5, %v5173_v3  ;;  %v5177_v29 = vpop.eup %5176  ;;  %v1770_v32 = vpop.f32.mrf.mxu0 }
 0x276   : > { %5190 = vpow2.f32 %v2337_v18  ;;  %v2343_v30 = vmul.f32 1.442695, %v2290_v19  ;;  %v2158_v31 = vmul.f32 2.0, %v2095_v21  ;;  %v4786_v33 = vpop.f32.mrf.mxu1  ;;  %4912 = vmatpush3.msra.mxu0 %v3164_v12  ;;  %v5179_v35 = vpop.eup %5178 }
 0x277   : > { %v2341_v36 = vmul.f32 1.442695, %v2289_v25  ;;  %v2292_v37 = vmin.f32 %v2260_v26, 0.0  ;;  %v2259_v38 = vmul.f32 -0.5, %v2227_v27  ;;  %v2230_v39 = vadd.f32 %v6224_v61, %v2191_v28  ;;  %4913 = vmatprep.subr.mxu0 %v3163_v24  ;;  %4813 = vmatprep.mubr.msk.f32.mxu0 %vm2366_vm5, %v5179_v35  ;;  %v4736_v42 = vpop.f32.mrf.mxu0 }
 0x278   : > { %v2190_v40 = vsub.f32 %v1770_v32, %v2158_v31  ;;  %v2161_v41 = vmul.f32 2.0, %v4786_v33  ;;  %v2105_v43 = vpop.f32.mrf.mxu1  ;;  %4914 = vmatpush3.msra.mxu0 %v3163_v24 }
 0x279   : > { %5192 = vpow2.f32 %v2341_v36  ;;  %v2291_v44 = vmin.f32 %v2259_v38, 0.0  ;;  %v2262_v45 = vmul.f32 -0.5, %v2230_v39  ;;  %4814 = vmatmul.mubr.msk.f32.gmra.mxu0 %vm2366_vm5, %v5177_v29  ;;  %4915 = vmatprep.subr.mxu0 %v3162_v34  ;;  %v2160_v49 = vmul.f32 2.0, %v2105_v43  ;;  %v1780_v50 = vpop.f32.mrf.mxu0 }
 0x27a   : > { %v5181_v46 = vpop.eup %5180  ;;  %5194 = vpow2.f32 %v2343_v30  ;;  %v2229_v47 = vadd.f32 %v6224_v61, %v2190_v40  ;;  %v2193_v48 = vsub.f32 %v4736_v42, %v2161_v41  ;;  %v4789_v51 = vpop.f32.mrf.mxu1  ;;  %4916 = vmatpush3.msra.mxu0 %v3162_v34  ;;  %v2347_v53 = vmul.f32 1.442695, %v2292_v37 }
 0x27b   : > { %v2345_v54 = vmul.f32 1.442695, %v2291_v44  ;;  %v2294_v55 = vmin.f32 %v2262_v45, 0.0  ;;  %v2163_v56 = vmul.f32 2.0, %v4789_v51  ;;  %4816 = vmatprep.mubr.msk.f32.mxu0 %vm2366_vm5, %v5181_v46  ;;  %v5183_v57 = vpop.eup %5182  ;;  %v2192_v60 = vsub.f32 %v1780_v50, %v2160_v49  ;;  %v4739_v52 = vpop.f32.mrf.mxu0 }
 0x27c   : > { %v2261_v58 = vmul.f32 -0.5, %v2229_v47  ;;  %v2232_v59 = vadd.f32 %v6224_v61, %v2193_v48  ;;  %v2115_v23 = vpop.f32.mrf.mxu1 }
 0x27d   : > { %5196 = vpow2.f32 %v2345_v54  ;;  %v2351_v63 = vmul.f32 1.442695, %v2294_v55  ;;  %v2195_v0 = vsub.f32 %v4739_v52, %v2163_v56  ;;  %v2162_v1 = vmul.f32 2.0, %v2115_v23  ;;  %4817 = vmatmul.mubr.msk.f32.gmra.mxu0 %vm2366_vm5, %v5183_v57  ;;  %v1790_v7 = vpop.f32.mrf.mxu0  ;;  %v3161_v55 = vld [vmem:[%s5773_s22 + $0x10] sm:$0xff]  ;;  %v3160_v56 = vld [vmem:[%s5773_s22 + $0x8] sm:$0xff]  ;;  %v3159_v57 = vld [vmem:[%s5773_s22] sm:$0xff] }
 0x27e   : > { %v5185_v2 = vpop.eup %5184  ;;  %v2293_v3 = vmin.f32 %v2261_v58, 0.0  ;;  %v2264_v4 = vmul.f32 -0.5, %v2232_v59  ;;  %v2231_v5 = vadd.f32 %v6224_v61, %v2192_v60  ;;  %v4792_v6 = vpop.f32.mrf.mxu1  ;;  %5198 = vpow2.f32 %v2347_v53  ;;  %4917 = vmatprep.subr.mxu0 %v3161_v55  ;;  %s6647_s22 = scalar_lea.vmem [#allocation13], %s5723_s3 }
 0x27f   : > { %v5187_v8 = vpop.eup %5186  ;;  %v2234_v9 = vadd.f32 %v6224_v61, %v2195_v0  ;;  %v2194_v10 = vsub.f32 %v1790_v7, %v2162_v1  ;;  %v2165_v11 = vmul.f32 2.0, %v4792_v6  ;;  %4819 = vmatprep.mubr.msk.f32.mxu0 %vm2366_vm5, %v5185_v2  ;;  %5200 = vpow2.f32 %v2351_v63  ;;  %v4742_v15 = vpop.f32.mrf.mxu0  ;;  %4918 = vmatpush3.msra.mxu0 %v3161_v55 }
 0x280   : > { %v2349_v12 = vmul.f32 1.442695, %v2293_v3  ;;  %v2296_v13 = vmin.f32 %v2264_v4, 0.0  ;;  %v2263_v14 = vmul.f32 -0.5, %v2231_v5  ;;  %v2125_v16 = vpop.f32.mrf.mxu1  ;;  %4919 = vmatprep.subr.mxu0 %v3160_v56 }
 0x281   : > { %v5189_v17 = vpop.eup %5188  ;;  %v2266_v18 = vmul.f32 -0.5, %v2234_v9  ;;  %v2233_v19 = vadd.f32 %v6224_v61, %v2194_v10  ;;  %v2197_v20 = vsub.f32 %v4742_v15, %v2165_v11  ;;  %v2164_v21 = vmul.f32 2.0, %v2125_v16  ;;  %4820 = vmatmul.mubr.msk.f32.gmra.mxu0 %vm2366_vm5, %v5187_v8  ;;  %v1800_v26 = vpop.f32.mrf.mxu0 }
 0x282   : > { %5202 = vpow2.f32 %v2349_v12  ;;  %v2355_v24 = vmul.f32 1.442695, %v2296_v13  ;;  %v2295_v25 = vmin.f32 %v2263_v14, 0.0  ;;  %4920 = vmatpush3.msra.mxu0 %v3160_v56 }
 0x283   : > { %v5191_v27 = vpop.eup %5190  ;;  %v2298_v28 = vmin.f32 %v2266_v18, 0.0  ;;  %v2265_v29 = vmul.f32 -0.5, %v2233_v19  ;;  %v2236_v30 = vadd.f32 %v6224_v61, %v2197_v20  ;;  %v2196_v31 = vsub.f32 %v1800_v26, %v2164_v21  ;;  %4921 = vmatprep.subr.mxu0 %v3159_v57 }
 0x284   : > { %v2353_v32 = vmul.f32 1.442695, %v2295_v25  ;;  %4822 = vmatprep.mubr.msk.f32.mxu0 %vm2366_vm5, %v5191_v27  ;;  %5204 = vpow2.f32 %v2355_v24  ;;  %4922 = vmatpush3.msra.mxu0 %v3159_v57 }
 0x285   : > { %v2297_v33 = vmin.f32 %v2265_v29, 0.0  ;;  %v2268_v34 = vmul.f32 -0.5, %v2236_v30  ;;  %v2235_v35 = vadd.f32 %v6224_v61, %v2196_v31  ;;  %4823 = vmatmul.mubr.msk.f32.gmra.mxu0 %vm2366_vm5, %v5189_v17  ;;  %v2359_v38 = vmul.f32 1.442695, %v2298_v28 }
 0x286   : > { %v5193_v36 = vpop.eup %5192  ;;  %5206 = vpow2.f32 %v2353_v32 }
 0x287   : > { %v5195_v37 = vpop.eup %5194  ;;  %v2357_v39 = vmul.f32 1.442695, %v2297_v33  ;;  %v2300_v40 = vmin.f32 %v2268_v34, 0.0  ;;  %v2267_v41 = vmul.f32 -0.5, %v2235_v35  ;;  %4825 = vmatprep.mubr.msk.f32.mxu0 %vm2366_vm5, %v5193_v36 }
 0x289   : > { %5208 = vpow2.f32 %v2357_v39  ;;  %v2299_v42 = vmin.f32 %v2267_v41, 0.0  ;;  %4826 = vmatmul.mubr.msk.f32.gmra.mxu0 %vm2366_vm5, %v5195_v37  ;;  %v2363_v44 = vmul.f32 1.442695, %v2300_v40 }
 0x28a   : > { %v5197_v43 = vpop.eup %5196  ;;  %5210 = vpow2.f32 %v2359_v38 }
 0x28b   : > { %v2361_v45 = vmul.f32 1.442695, %v2299_v42  ;;  %4828 = vmatprep.mubr.msk.f32.mxu0 %vm2366_vm5, %v5197_v43  ;;  %v5199_v61 = vpop.eup %5198 }
 0x28c   : > { %v5201_v46 = vpop.eup %5200 }
 0x28d   : > { %5212 = vpow2.f32 %v2361_v45  ;;  %4829 = vmatmul.mubr.msk.f32.gmra.mxu0 %vm2366_vm5, %v5199_v61 }
 0x28e   : > { %5214 = vpow2.f32 %v2363_v44 }
 0x28f   : > { %v5203_v47 = vpop.eup %5202  ;;  %v4861_v58 = vpop.f32.mrf.mxu1 }
 0x290   : > { %4831 = vmatprep.mubr.msk.f32.mxu0 %vm2366_vm5, %v5203_v47 }
 0x291   : > { %4832 = vmatmul.mubr.msk.f32.gmra.mxu0 %vm2366_vm5, %v5201_v46  ;;  %v5205_v48 = vpop.eup %5204  ;;  %v3000_v59 = vpop.f32.mrf.mxu1 }
 0x293   : > { %v5207_v49 = vpop.eup %5206  ;;  %v4862_v60 = vpop.f32.mrf.mxu1 }
 0x294   : > { %4834 = vmatprep.mubr.msk.f32.mxu0 %vm2366_vm5, %v5207_v49 }
 0x295   : > { %4835 = vmatmul.mubr.msk.f32.gmra.mxu0 %vm2366_vm5, %v5205_v48  ;;  %v3003_v52 = vpop.f32.mrf.mxu1 }
 0x296   : > { %v5209_v50 = vpop.eup %5208 }
 0x297   : > { %4837 = vmatprep.mubr.msk.f32.mxu0 %vm2366_vm5, %v5209_v50  ;;  %v5211_v51 = vpop.eup %5210  ;;  %v4865_v23 = vpop.f32.mrf.mxu1 }
 0x299   : > { %4838 = vmatmul.mubr.msk.f32.gmra.mxu0 %vm2366_vm5, %v5211_v51  ;;  %v3016_v63 = vpop.f32.mrf.mxu1 }
 0x29a   : > { %v5213_v53 = vpop.eup %5212 }
 0x29b   : > { %4840 = vmatprep.mubr.msk.f32.mxu0 %vm2366_vm5, %v5213_v53  ;;  %v5215_v54 = vpop.eup %5214  ;;  %v4866_v0 = vpop.f32.mrf.mxu1 }
 0x29d   : > { %4841 = vmatmul.mubr.msk.f32.gmra.mxu0 %vm2366_vm5, %v5215_v54  ;;  %v3019_v1 = vpop.f32.mrf.mxu1 }
 0x29f   : > { %v4869_v2 = vpop.f32.mrf.mxu1 }
 0x2a1   : > { %v3032_v3 = vpop.f32.mrf.mxu1 }
 0x2a3   : > { %v4870_v4 = vpop.f32.mrf.mxu1 }
 0x2a5   : > { %v3035_v5 = vpop.f32.mrf.mxu1 }
 0x2a7   : > { %v4873_v7 = vpop.f32.mrf.mxu1 }
 0x2a9   : > { %v3048_v6 = vpop.f32.mrf.mxu1 }
 0x2ab   : > { %v4874_v8 = vpop.f32.mrf.mxu1 }
 0x2ad   : > { %v3051_v9 = vpop.f32.mrf.mxu1 }
 0x2af   : > { %v6310_v10 = vpop.f32.mrf.mxu1 }
 0x2b1   : > { %v3064_v14 = vpop.f32.mrf.mxu1 }
 0x2b3   : > { %v4878_v19 = vpop.f32.mrf.mxu1 }
 0x2b5   : > { %v3067_v25 = vpop.f32.mrf.mxu1 }
 0x2b7   : > { %v4881_v30 = vpop.f32.mrf.mxu1 }
 0x2b9   : > { %v3080_v35 = vpop.f32.mrf.mxu1 }
 0x2bb   : > { %v4882_v40 = vpop.f32.mrf.mxu1 }
 0x2bd   : > { %v3083_v45 = vpop.f32.mrf.mxu1 }
 0x2bf   : > { %v4885_v49 = vpop.f32.mrf.mxu1 }
 0x2c1   : > { %v3096_v55 = vpop.f32.mrf.mxu1 }
 0x31f   : > { %v4797_v11 = vpop.f32.mrf.mxu0 }
 0x320   : > { %v3128_v15 = vmul.f32 %v4797_v11, %v3003_v52 }
 0x321   : > { %v2533_v12 = vpop.f32.mrf.mxu0 }
 0x322   : > { %v3127_v13 = vmul.f32 %v3000_v59, %v2533_v12 }
 0x323   : > { %v4800_v16 = vpop.f32.mrf.mxu0 }
 0x324   : > { %4923 = vmatprep.mubr.f32.mxu0 %v3127_v13  ;;  %v3130_v20 = vmul.f32 %v4862_v60, %v4800_v16  ;;  %v4886_v60 = vpop.f32.mrf.mxu1 }
 0x325   : > { %v2543_v17 = vpop.f32.mrf.mxu0  ;;  %4924 = vmatmul.mubr.f32.vlgmr.msra.gmra.mxu0 %v3128_v15 }
 0x326   : > { %v3129_v18 = vmul.f32 %v4861_v58, %v2543_v17 }
 0x328   : > { %v4803_v21 = vpop.f32.mrf.mxu0  ;;  %4926 = vmatprep.mubr.f32.mxu0 %v3129_v18 }
 0x329   : > { %4927 = vmatmul.mubr.f32.gmra.mxu0 %v3130_v20  ;;  %v3132_v27 = vmul.f32 %v4803_v21, %v3019_v1  ;;  %v3099_v1 = vpop.f32.mrf.mxu1 }
 0x32a   : > { %v2553_v24 = vpop.f32.mrf.mxu0 }
 0x32b   : > { %v3131_v26 = vmul.f32 %v3016_v63, %v2553_v24 }
 0x32c   : > { %v4806_v28 = vpop.f32.mrf.mxu0 }
 0x32d   : > { %4929 = vmatprep.mubr.f32.mxu0 %v3131_v26  ;;  %v3134_v32 = vmul.f32 %v4866_v0, %v4806_v28 }
 0x32e   : > { %v2563_v29 = vpop.f32.mrf.mxu0  ;;  %4930 = vmatmul.mubr.f32.gmra.mxu0 %v3132_v27 }
 0x32f   : > { %v3133_v31 = vmul.f32 %v4865_v23, %v2563_v29 }
 0x330   : > { %v4809_v33 = vpop.f32.mrf.mxu0 }
 0x331   : > { %4932 = vmatprep.mubr.f32.mxu0 %v3133_v31  ;;  %v3136_v37 = vmul.f32 %v4809_v33, %v3035_v5 }
 0x332   : > { %v2573_v34 = vpop.f32.mrf.mxu0  ;;  %4933 = vmatmul.mubr.f32.gmra.mxu0 %v3134_v32  ;;  %v3417_v32 = vld [vmem:[#allocation5] sm:$0x3] }
 0x333   : > { %v3135_v36 = vmul.f32 %v3032_v3, %v2573_v34 }
 0x335   : > { %v4812_v38 = vpop.f32.mrf.mxu0  ;;  %4935 = vmatprep.mubr.f32.mxu0 %v3135_v36 }
 0x336   : > { %4936 = vmatmul.mubr.f32.gmra.mxu0 %v3136_v37  ;;  %v3138_v42 = vmul.f32 %v4870_v4, %v4812_v38 }
 0x337   : > { %v2583_v39 = vpop.f32.mrf.mxu0 }
 0x338   : > { %v3137_v41 = vmul.f32 %v4869_v2, %v2583_v39 }
 0x339   : > { %v4815_v43 = vpop.f32.mrf.mxu0 }
 0x33a   : > { %4938 = vmatprep.mubr.f32.mxu0 %v3137_v41  ;;  %v3140_v46 = vmul.f32 %v4815_v43, %v3051_v9 }
 0x33b   : > { %v2593_v44 = vpop.f32.mrf.mxu0  ;;  %4939 = vmatmul.mubr.f32.gmra.mxu0 %v3138_v42 }
 0x33c   : > { %v3139_v61 = vmul.f32 %v3048_v6, %v2593_v44 }
 0x33d   : > { %v4818_v47 = vpop.f32.mrf.mxu0 }
 0x33e   : > { %4941 = vmatprep.mubr.f32.mxu0 %v3139_v61  ;;  %v3142_v51 = vmul.f32 %v4874_v8, %v4818_v47 }
 0x33f   : > { %v2603_v48 = vpop.f32.mrf.mxu0  ;;  %4942 = vmatmul.mubr.f32.gmra.mxu0 %v3140_v46 }
 0x340   : > { %v3141_v50 = vmul.f32 %v4873_v7, %v2603_v48  ;;  %v4889_v7 = vpop.f32.mrf.mxu1 }
 0x341   : > { %v4821_v53 = vpop.f32.mrf.mxu0 }
 0x342   : > { %4944 = vmatprep.mubr.f32.mxu0 %v3141_v50  ;;  %v3144_v57 = vmul.f32 %v4821_v53, %v3067_v25 }
 0x343   : > { %v2613_v54 = vpop.f32.mrf.mxu0  ;;  %4945 = vmatmul.mubr.f32.gmra.mxu0 %v3142_v51 }
 0x344   : > { %v3143_v56 = vmul.f32 %v3064_v14, %v2613_v54 }
 0x345   : > { %v4824_v58 = vpop.f32.mrf.mxu0 }
 0x346   : > { %4947 = vmatprep.mubr.f32.mxu0 %v3143_v56  ;;  %v3146_v23 = vmul.f32 %v4878_v19, %v4824_v58 }
 0x347   : > { %v2623_v59 = vpop.f32.mrf.mxu0  ;;  %4948 = vmatmul.mubr.f32.gmra.mxu0 %v3144_v57 }
 0x348   : > { %v3145_v52 = vmul.f32 %v6310_v10, %v2623_v59  ;;  %v3112_v10 = vpop.f32.mrf.mxu1  ;;  %v6632_v59 = vmov 0 }
 0x349   : > { %v4827_v63 = vpop.f32.mrf.mxu0 }
 0x34a   : > { %4950 = vmatprep.mubr.f32.mxu0 %v3145_v52  ;;  %v3148_v3 = vmul.f32 %v4827_v63, %v3083_v45  ;;  %v4890_v16 = vpop.f32.mrf.mxu1  ;;  %v6634_v52 = vmov 0 }
 0x34b   : > { %v2633_v0 = vpop.f32.mrf.mxu0  ;;  %4951 = vmatmul.mubr.f32.gmra.mxu0 %v3146_v23 }
 0x34c   : > { %v3147_v2 = vmul.f32 %v3080_v35, %v2633_v0  ;;  %v3115_v21 = vpop.f32.mrf.mxu1 }
 0x34d   : > { %v4830_v4 = vpop.f32.mrf.mxu0 }
 0x34e   : > { %4953 = vmatprep.mubr.f32.mxu0 %v3147_v2  ;;  %v3150_v8 = vmul.f32 %v4882_v40, %v4830_v4  ;;  %v6507_v40 = vld [vmem:[%s6647_s22] ss:$0 sm:$0xff] }
 0x34f   : > { %v2643_v5 = vpop.f32.mrf.mxu0  ;;  %4954 = vmatmul.mubr.f32.gmra.mxu0 %v3148_v3 }
 0x350   : > { %v3149_v6 = vmul.f32 %v4881_v30, %v2643_v5  ;;  %v6314_v30 = vshrl.u32 %v2724_v62, 7  ;;  %v6636_v5 = vmov 0 }
 0x351   : > { %v4833_v9 = vpop.f32.mrf.mxu0 }
 0x352   : > { %4956 = vmatprep.mubr.f32.mxu0 %v3149_v6  ;;  %v3152_v13 = vmul.f32 %v4833_v9, %v3099_v1  ;;  %v3424_v31 = vsub.s32 1, %v6314_v30  ;;  %v3420_v33 = vsub.s32 0, %v6314_v30  ;;  %v3402_v34 = vadd.s32 8, %v6314_v30 }
 0x353   : > { %v2653_v11 = vpop.f32.mrf.mxu0  ;;  %4957 = vmatmul.mubr.f32.gmra.mxu0 %v3150_v8  ;;  %v3403_v37 = vadd.s32 16, %v6314_v30  ;;  %v3404_v38 = vadd.s32 24, %v6314_v30  ;;  %v3405_v41 = vadd.s32 32, %v6314_v30  ;;  %v3406_v42 = vadd.s32 40, %v6314_v30 }
 0x354   : > { %v3151_v12 = vmul.f32 %v3096_v55, %v2653_v11  ;;  %v6319_v35 = vrot.slane %v3417_v32, %v3424_v31  ;;  %v6321_v36 = vrot.slane %v3417_v32, %v3420_v33  ;;  %v3407_v45 = vadd.s32 48, %v6314_v30 }
 0x355   : > { %v4836_v14 = vpop.f32.mrf.mxu0  ;;  %v3408_v61 = vadd.s32 56, %v6314_v30  ;;  %v3409_v48 = vadd.s32 64, %v6314_v30  ;;  %v3411_v55 = vadd.s32 80, %v6314_v30  ;;  %v3412_v56 = vadd.s32 88, %v6314_v30 }
 0x356   : > { %4959 = vmatprep.mubr.f32.mxu0 %v3151_v12  ;;  %v3154_v18 = vmul.f32 %v4886_v60, %v4836_v14  ;;  %vm3427_vm6 = vcmp.eq.s32.totalorder %v6314_v30, %v6319_v35  ;;  %vm3429_vm7 = vcmp.eq.s32.totalorder %v3402_v34, %v6319_v35  ;;  %vm3428_vm8 = vcmp.eq.s32.totalorder %v3402_v34, %v6321_v36 }
 0x357   : > { %v2663_v15 = vpop.f32.mrf.mxu0  ;;  %4960 = vmatmul.mubr.f32.gmra.mxu0 %v3152_v13  ;;  %vm4222_vm9 = vmpackc.low %vm3429_vm7, %vm3427_vm6  ;;  %vm3426_vm10 = vcmp.eq.s32.totalorder %v6314_v30, %v6321_v36  ;;  %vm3431_vm12 = vcmp.eq.s32.totalorder %v3403_v37, %v6319_v35  ;;  %vm3433_vm13 = vcmp.eq.s32.totalorder %v3404_v38, %v6319_v35  ;;  %vm3430_vm14 = vcmp.eq.s32.totalorder %v3403_v37, %v6321_v36 }
 0x358   : > { %v3153_v17 = vmul.f32 %v4885_v49, %v2663_v15  ;;  %4223 = vmatprep.mubr.msk.bf16.mxu1 %vm4222_vm9, %v5483_v22  ;;  %vm6330_vm11 = vmpackc.low %vm3428_vm8, %vm3426_vm10  ;;  %vm3432_vm15 = vcmp.eq.s32.totalorder %v3404_v38, %v6321_v36  ;;  %vm3435_vm2 = vcmp.eq.s32.totalorder %v3405_v41, %v6319_v35  ;;  %vm3437_vm3 = vcmp.eq.s32.totalorder %v3406_v42, %v6319_v35 }
 0x359   : > { %v4839_v19 = vpop.f32.mrf.mxu0  ;;  %vm6340_vm0 = vmpackc.low %vm3433_vm13, %vm3431_vm12  ;;  %vm3434_vm4 = vcmp.eq.s32.totalorder %v3405_v41, %v6321_v36  ;;  %vm3436_vm5 = vcmp.eq.s32.totalorder %v3406_v42, %v6321_v36  ;;  %vm3439_vm8 = vcmp.eq.s32.totalorder %v3407_v45, %v6319_v35  ;;  %vm3441_vm9 = vcmp.eq.s32.totalorder %v3408_v61, %v6319_v35 }
 0x35a   : > { %4962 = vmatprep.mubr.f32.mxu0 %v3153_v17  ;;  %v3156_v25 = vmul.f32 %v4839_v19, %v3115_v21  ;;  %vm6344_vm1 = vmpackc.low %vm3432_vm15, %vm3430_vm14  ;;  %vm3438_vm10 = vcmp.eq.s32.totalorder %v3407_v45, %v6321_v36  ;;  %vm3440_vm12 = vcmp.eq.s32.totalorder %v3408_v61, %v6321_v36  ;;  %v3410_v49 = vadd.s32 72, %v6314_v30 }
 0x35b   : > { %v2673_v20 = vpop.f32.mrf.mxu0  ;;  %4963 = vmatmul.mubr.f32.gmra.mxu0 %v3154_v18  ;;  %vm6354_vm6 = vmpackc.low %vm3437_vm3, %vm3435_vm2  ;;  %vm3443_vm15 = vcmp.eq.s32.totalorder %v3409_v48, %v6319_v35  ;;  %vm3442_vm3 = vcmp.eq.s32.totalorder %v3409_v48, %v6321_v36  ;;  %v3413_v0 = vadd.s32 96, %v6314_v30  ;;  %v3414_v1 = vadd.s32 104, %v6314_v30 }
 0x35c   : > { %v3155_v24 = vmul.f32 %v3112_v10, %v2673_v20  ;;  %vm6358_vm7 = vmpackc.low %vm3436_vm5, %vm3434_vm4  ;;  %vm3445_vm2 = vcmp.eq.s32.totalorder %v3410_v49, %v6319_v35  ;;  %vm3444_vm4 = vcmp.eq.s32.totalorder %v3410_v49, %v6321_v36  ;;  %v3415_v11 = vadd.s32 112, %v6314_v30 }
 0x35d   : > { %v4842_v26 = vpop.f32.mrf.mxu0  ;;  %vm6368_vm13 = vmpackc.low %vm3441_vm9, %vm3439_vm8  ;;  %vm3447_vm9 = vcmp.eq.s32.totalorder %v3411_v55, %v6319_v35  ;;  %v3416_v10 = vadd.s32 120, %v6314_v30 }
 0x35e   : > { %4965 = vmatprep.mubr.f32.mxu0 %v3155_v24  ;;  %v3158_v29 = vmul.f32 %v4890_v16, %v4842_v26  ;;  %vm6372_vm14 = vmpackc.low %vm3440_vm12, %vm3438_vm10  ;;  %vm3449_vm10 = vcmp.eq.s32.totalorder %v3412_v56, %v6319_v35  ;;  %vm3446_vm12 = vcmp.eq.s32.totalorder %v3411_v55, %v6321_v36 }
 0x35f   : > { %v2683_v27 = vpop.f32.mrf.mxu0  ;;  %4966 = vmatmul.mubr.f32.gmra.mxu0 %v3156_v25  ;;  %vm6382_vm5 = vmpackc.low %vm3445_vm2, %vm3443_vm15  ;;  %vm3448_vm15 = vcmp.eq.s32.totalorder %v3412_v56, %v6321_v36 }
 0x360   : > { %v3157_v28 = vmul.f32 %v4889_v7, %v2683_v27  ;;  %vm6386_vm8 = vmpackc.low %vm3444_vm4, %vm3442_vm3  ;;  %vm3451_vm4 = vcmp.eq.s32.totalorder %v3413_v0, %v6319_v35 }
 0x361   : > { %vm6404_vm2 = vmpackc.low %vm3449_vm10, %vm3447_vm9  ;;  %vm3453_vm9 = vcmp.eq.s32.totalorder %v3414_v1, %v6319_v35  ;;  %vm3450_vm10 = vcmp.eq.s32.totalorder %v3413_v0, %v6321_v36 }
 0x362   : > { %4968 = vmatprep.mubr.f32.mxu0 %v3157_v28  ;;  %v6633_v59 = vsel %vm6404_vm2, 4294967295, %v6632_v59  ;;  %vm6410_vm3 = vmpackc.low %vm3448_vm15, %vm3446_vm12  ;;  %vm3452_vm15 = vcmp.eq.s32.totalorder %v3414_v1, %v6321_v36  ;;  %vm3455_vm2 = vcmp.eq.s32.totalorder %v3415_v11, %v6319_v35 }
 0x363   : > { %4969 = vmatmul.mubr.f32.gmra.mxu0 %v3158_v29  ;;  %v6635_v52 = vsel %vm6410_vm3, 4294967295, %v6634_v52  ;;  %vm6427_vm12 = vmpackc.low %vm3453_vm9, %vm3451_vm4  ;;  %vm3457_vm4 = vcmp.eq.s32.totalorder %v3416_v10, %v6319_v35  ;;  %vm3454_vm9 = vcmp.eq.s32.totalorder %v3415_v11, %v6321_v36 }
 0x364   : > { %v6637_v5 = vsel %vm6427_vm12, 4294967295, %v6636_v5  ;;  %vm6432_vm3 = vmpackc.low %vm3452_vm15, %vm3450_vm10  ;;  %vm3456_vm10 = vcmp.eq.s32.totalorder %v3416_v10, %v6321_v36 }
 0x365   : > { %vm6441_vm12 = vmpackc.low %vm3457_vm4, %vm3455_vm2 }
 0x366   : > { %vm6446_vm15 = vmpackc.low %vm3456_vm10, %vm3454_vm9 }
 0x3e5   : > { %v6390_v53 = vpop.f32.mrf.mxu0 }
 0x3e7   : > { %v6392_v54 = vpop.f32.mrf.mxu0 }
 0x3e8   : > { %v3522_v57 = vpack.c.bf16 %v6390_v53, %v6392_v54 }
 0x3e9   : > { %v6398_v58 = vpop.f32.mrf.mxu0 }
 0x3eb   : > { %v6408_v60 = vpop.f32.mrf.mxu0 }
 0x3ec   : > { %v3523_v23 = vpack.c.bf16 %v6398_v58, %v6408_v60 }
 0x3ee   : > { %v6416_v63 = vpop.f32.mrf.mxu0 }
 0x3f0   : > { %v6420_v2 = vpop.f32.mrf.mxu0 }
 0x3f1   : > { %v3524_v3 = vpack.c.bf16 %v6416_v63, %v6420_v2 }
 0x3f2   : > { %v4934_v4 = vpop.f32.mrf.mxu0 }
 0x3f4   : > { %v3271_v6 = vpop.f32.mrf.mxu0 }
 0x3f5   : > { %v3525_v8 = vpack.c.bf16 %v4934_v4, %v3271_v6 }
 0x3f6   : > { %v4937_v9 = vpop.f32.mrf.mxu0 }
 0x3f8   : > { %v3281_v12 = vpop.f32.mrf.mxu0 }
 0x3f9   : > { %v3526_v56 = vpack.c.bf16 %v4937_v9, %v3281_v12 }
 0x3fb   : > { %v4940_v13 = vpop.f32.mrf.mxu0 }
 0x3fd   : > { %v3291_v16 = vpop.f32.mrf.mxu0 }
 0x3fe   : > { %v3527_v49 = vpack.c.bf16 %v4940_v13, %v3291_v16 }
 0x3ff   : > { %v4943_v17 = vpop.f32.mrf.mxu0 }
 0x401   : > { %v3301_v18 = vpop.f32.mrf.mxu0 }
 0x402   : > { %v3528_v61 = vpack.c.bf16 %v4943_v17, %v3301_v18 }
 0x403   : > { %v4946_v19 = vpop.f32.mrf.mxu0 }
 0x405   : > { %v3311_v20 = vpop.f32.mrf.mxu0 }
 0x406   : > { %v3529_v42 = vpack.c.bf16 %v4946_v19, %v3311_v20 }
 0x407   : > { %v4949_v21 = vpop.f32.mrf.mxu0 }
 0x409   : > { %v3321_v24 = vpop.f32.mrf.mxu0 }
 0x40a   : > { %v3530_v6 = vpack.c.bf16 %v4949_v21, %v3321_v24 }
 0x40b   : > { %v4952_v25 = vpop.f32.mrf.mxu0 }
 0x40d   : > { %v3331_v26 = vpop.f32.mrf.mxu0 }
 0x40e   : > { %v3531_v4 = vpack.c.bf16 %v4952_v25, %v3331_v26 }
 0x40f   : > { %v4955_v27 = vpop.f32.mrf.mxu0 }
 0x411   : > { %v3341_v28 = vpop.f32.mrf.mxu0 }
 0x412   : > { %v3532_v1 = vpack.c.bf16 %v4955_v27, %v3341_v28 }
 0x413   : > { %v4958_v29 = vpop.f32.mrf.mxu0 }
 0x415   : > { %v3351_v30 = vpop.f32.mrf.mxu0 }
 0x416   : > { %v3533_v0 = vpack.c.bf16 %v4958_v29, %v3351_v30 }
 0x417   : > { %v4961_v31 = vpop.f32.mrf.mxu0 }
 0x419   : > { %v3361_v32 = vpop.f32.mrf.mxu0 }
 0x41a   : > { %v3534_v55 = vpack.c.bf16 %v4961_v31, %v3361_v32 }
 0x41b   : > { %v4964_v33 = vpop.f32.mrf.mxu0 }
 0x41d   : > { %v3371_v34 = vpop.f32.mrf.mxu0 }
 0x41e   : > { %v3535_v48 = vpack.c.bf16 %v4964_v33, %v3371_v34 }
 0x41f   : > { %v4967_v35 = vpop.f32.mrf.mxu0 }
 0x421   : > { %v3381_v36 = vpop.f32.mrf.mxu0 }
 0x422   : > { %v3536_v45 = vpack.c.bf16 %v4967_v35, %v3381_v36 }
 0x423   : > { %v4970_v37 = vpop.f32.mrf.mxu0 }
 0x425   : > { %v3391_v38 = vpop.f32.mrf.mxu0 }
 0x426   : > { %v3537_v41 = vpack.c.bf16 %v4970_v37, %v3391_v38 }
 0x428   : > { %4547 = vmatprep.subr.bf16.mxu1 %v3537_v41 }
 0x429   : > { %4548 = vmatpush3.bf16.msra.mxu1 %v3529_v42 }
 0x42a   : > { %4549 = vmatprep.subr.bf16.mxu1 %v3536_v45 }
 0x42d   : > { %4550 = vmatpush3.bf16.msra.mxu1 %v3528_v61 }
 0x42e   : > { %4551 = vmatprep.subr.bf16.mxu1 %v3535_v48 }
 0x431   : > { %4552 = vmatpush3.bf16.msra.mxu1 %v3527_v49 }
 0x432   : > { %4553 = vmatprep.subr.bf16.mxu1 %v3534_v55 }
 0x435   : > { %4554 = vmatpush3.bf16.msra.mxu1 %v3526_v56 }
 0x436   : > { %4555 = vmatprep.subr.bf16.mxu1 %v3533_v0 }
 0x439   : > { %4556 = vmatpush3.bf16.msra.mxu1 %v3525_v8 }
 0x43a   : > { %4557 = vmatprep.subr.bf16.mxu1 %v3532_v1 }
 0x43d   : > { %4558 = vmatpush3.bf16.msra.mxu1 %v3524_v3 }
 0x43e   : > { %4559 = vmatprep.subr.bf16.mxu1 %v3531_v4 }
 0x441   : > { %4560 = vmatpush3.bf16.msra.mxu1 %v3523_v23 }
 0x442   : > { %4561 = vmatprep.subr.bf16.mxu1 %v3530_v6 }
 0x445   : > { %4562 = vmatpush3.bf16.msra.mxu1 %v3522_v57 }
 0x448   : > { %4225 = vmatmul.mubr.msk.bf16.vlgmr.msra.gmra.mxu1 %vm6330_vm11, %v5483_v22  ;;  %vm6644_vm11 = vnez %v6633_v59 }
 0x449   : > { %4227 = vmatprep.mubr.msk.bf16.mxu1 %vm6340_vm0, %v5483_v22  ;;  %vm6645_vm0 = vnez %v6635_v52 }
 0x450   : > { %4229 = vmatmul.mubr.msk.bf16.gmra.mxu1 %vm6344_vm1, %v5483_v22  ;;  %vm6646_vm1 = vnez %v6637_v5 }
 0x451   : > { %4231 = vmatprep.mubr.msk.bf16.mxu1 %vm6354_vm6, %v5483_v22 }
 0x458   : > { %4233 = vmatmul.mubr.msk.bf16.gmra.mxu1 %vm6358_vm7, %v5483_v22 }
 0x459   : > { %4235 = vmatprep.mubr.msk.bf16.mxu1 %vm6368_vm13, %v5483_v22 }
 0x460   : > { %4237 = vmatmul.mubr.msk.bf16.gmra.mxu1 %vm6372_vm14, %v5483_v22 }
 0x461   : > { %4239 = vmatprep.mubr.msk.bf16.mxu1 %vm6382_vm5, %v5483_v22 }
 0x468   : > { %4241 = vmatmul.mubr.msk.bf16.gmra.mxu1 %vm6386_vm8, %v5483_v22 }
 0x469   : > { %4243 = vmatprep.mubr.msk.bf16.mxu1 %vm6644_vm11, %v5483_v22 }
 0x470   : > { %4245 = vmatmul.mubr.msk.bf16.gmra.mxu1 %vm6645_vm0, %v5483_v22 }
 0x471   : > { %4247 = vmatprep.mubr.msk.bf16.mxu1 %vm6646_vm1, %v5483_v22 }
 0x478   : > { %4249 = vmatmul.mubr.msk.bf16.gmra.mxu1 %vm6432_vm3, %v5483_v22 }
 0x479   : > { %4251 = vmatprep.mubr.msk.bf16.mxu1 %vm6441_vm12, %v5483_v22 }
 0x480   : > { %4253 = vmatmul.mubr.msk.bf16.gmra.mxu1 %vm6446_vm15, %v5483_v22 }
 0x508   : > { %v4563_v62 = vpop.f32.mrf.mxu1 }
 0x50a   : > { %v4564_v39 = vpop.f32.mrf.mxu1 }
 0x50b   : > { %v4565_v43 = vadd.f32 %v4564_v39, %v4563_v62 }
 0x50c   : > { %v4566_v44 = vpop.f32.mrf.mxu1 }
 0x50d   : > { %v3693_v46 = vadd.f32 %v4565_v43, %v6507_v40 }
 0x50e   : > { %v4567_v47 = vpop.f32.mrf.mxu1 }
 0x50f   : > { %3709 = vst [vmem:[#allocation2 + $0x30] sm:$0xff] %v3693_v46  ;;  %v4568_v50 = vadd.f32 %v4567_v47, %v4566_v44 }
 0x510   : > { %v4569_v51 = vpop.f32.mrf.mxu1 }
 0x511   : > { %v3694_v53 = vadd.f32 %v4568_v50, %v6507_v40 }
 0x512   : > { %v4570_v54 = vpop.f32.mrf.mxu1 }
 0x513   : > { %3710 = vst [vmem:[#allocation2] sm:$0xff] %v3694_v53  ;;  %v4571_v57 = vadd.f32 %v4570_v54, %v4569_v51 }
 0x514   : > { %v4572_v22 = vpop.f32.mrf.mxu1 }
 0x515   : > { %v3695_v58 = vadd.f32 %v4571_v57, %v6507_v40 }
 0x516   : > { %v4573_v59 = vpop.f32.mrf.mxu1  ;;  %v3730_v39 = vld [vmem:[#allocation2 + $0x30] sm:$0xff] (%p3725_p13) }
 0x517   : > { %3711 = vst [vmem:[#allocation2 + $0x58] sm:$0xff] %v3695_v58  ;;  %v4574_v60 = vadd.f32 %v4573_v59, %v4572_v22  ;;  %3746 = vst [vmem:[#allocation16] sm:$0xff] (%p3725_p13), %v3730_v39 }
 0x518   : > { %v4575_v52 = vpop.f32.mrf.mxu1 }
 0x519   : > { %v3696_v23 = vadd.f32 %v4574_v60, %v6507_v40 }
 0x51a   : > { %v4576_v63 = vpop.f32.mrf.mxu1  ;;  %v3731_v43 = vld [vmem:[#allocation2] sm:$0xff] (%p3725_p13) }
 0x51b   : > { %3712 = vst [vmem:[#allocation2 + $0x18] sm:$0xff] %v3696_v23  ;;  %v4577_v2 = vadd.f32 %v4576_v63, %v4575_v52  ;;  %3747 = vst [vmem:[#allocation16 + $0x8] sm:$0xff] (%p3725_p13), %v3731_v43 }
 0x51c   : > { %v4578_v3 = vpop.f32.mrf.mxu1 }
 0x51d   : > { %v3697_v5 = vadd.f32 %v4577_v2, %v6507_v40 }
 0x51e   : > { %v4579_v7 = vpop.f32.mrf.mxu1  ;;  %v3732_v44 = vld [vmem:[#allocation2 + $0x58] sm:$0xff] (%p3725_p13) }
 0x51f   : > { %3713 = vst [vmem:[#allocation2 + $0x50] sm:$0xff] %v3697_v5  ;;  %v4580_v8 = vadd.f32 %v4579_v7, %v4578_v3  ;;  %3748 = vst [vmem:[#allocation16 + $0x10] sm:$0xff] (%p3725_p13), %v3732_v44 }
 0x520   : > { %v4581_v9 = vpop.f32.mrf.mxu1 }
 0x521   : > { %v3698_v11 = vadd.f32 %v4580_v8, %v6507_v40 }
 0x522   : > { %v4582_v10 = vpop.f32.mrf.mxu1  ;;  %v3733_v46 = vld [vmem:[#allocation2 + $0x18] sm:$0xff] (%p3725_p13) }
 0x523   : > { %3714 = vst [vmem:[#allocation2 + $0x68] sm:$0xff] %v3698_v11  ;;  %v4583_v12 = vadd.f32 %v4582_v10, %v4581_v9  ;;  %3749 = vst [vmem:[#allocation16 + $0x18] sm:$0xff] (%p3725_p13), %v3733_v46 }
 0x524   : > { %v4584_v13 = vpop.f32.mrf.mxu1 }
 0x525   : > { %v3699_v14 = vadd.f32 %v4583_v12, %v6507_v40 }
 0x526   : > { %v4585_v15 = vpop.f32.mrf.mxu1  ;;  %v3734_v47 = vld [vmem:[#allocation2 + $0x50] sm:$0xff] (%p3725_p13) }
 0x527   : > { %3715 = vst [vmem:[#allocation2 + $0x8] sm:$0xff] %v3699_v14  ;;  %v4586_v16 = vadd.f32 %v4585_v15, %v4584_v13  ;;  %3750 = vst [vmem:[#allocation16 + $0x20] sm:$0xff] (%p3725_p13), %v3734_v47 }
 0x528   : > { %v4587_v17 = vpop.f32.mrf.mxu1 }
 0x529   : > { %v3700_v18 = vadd.f32 %v4586_v16, %v6507_v40 }
 0x52a   : > { %v4588_v19 = vpop.f32.mrf.mxu1  ;;  %v3735_v50 = vld [vmem:[#allocation2 + $0x68] sm:$0xff] (%p3725_p13) }
 0x52b   : > { %3716 = vst [vmem:[#allocation2 + $0x48] sm:$0xff] %v3700_v18  ;;  %v4589_v20 = vadd.f32 %v4588_v19, %v4587_v17  ;;  %3751 = vst [vmem:[#allocation16 + $0x28] sm:$0xff] (%p3725_p13), %v3735_v50 }
 0x52c   : > { %v4590_v21 = vpop.f32.mrf.mxu1 }
 0x52d   : > { %v3701_v24 = vadd.f32 %v4589_v20, %v6507_v40 }
 0x52e   : > { %v4591_v25 = vpop.f32.mrf.mxu1  ;;  %v3736_v51 = vld [vmem:[#allocation2 + $0x8] sm:$0xff] (%p3725_p13) }
 0x52f   : > { %3717 = vst [vmem:[#allocation2 + $0x40] sm:$0xff] %v3701_v24  ;;  %v4592_v26 = vadd.f32 %v4591_v25, %v4590_v21  ;;  %3752 = vst [vmem:[#allocation16 + $0x30] sm:$0xff] (%p3725_p13), %v3736_v51 }
 0x530   : > { %v4593_v27 = vpop.f32.mrf.mxu1 }
 0x531   : > { %v3702_v28 = vadd.f32 %v4592_v26, %v6507_v40 }
 0x532   : > { %v4594_v29 = vpop.f32.mrf.mxu1  ;;  %v3737_v53 = vld [vmem:[#allocation2 + $0x48] sm:$0xff] (%p3725_p13) }
 0x533   : > { %3718 = vst [vmem:[#allocation2 + $0x20] sm:$0xff] %v3702_v28  ;;  %v4595_v30 = vadd.f32 %v4594_v29, %v4593_v27  ;;  %3753 = vst [vmem:[#allocation16 + $0x38] sm:$0xff] (%p3725_p13), %v3737_v53 }
 0x534   : > { %v4596_v31 = vpop.f32.mrf.mxu1 }
 0x535   : > { %v3703_v32 = vadd.f32 %v4595_v30, %v6507_v40 }
 0x536   : > { %v4597_v33 = vpop.f32.mrf.mxu1  ;;  %v3738_v54 = vld [vmem:[#allocation2 + $0x40] sm:$0xff] (%p3725_p13) }
 0x537   : > { %3719 = vst [vmem:[#allocation2 + $0x10] sm:$0xff] %v3703_v32  ;;  %v4598_v34 = vadd.f32 %v4597_v33, %v4596_v31  ;;  %3754 = vst [vmem:[#allocation16 + $0x40] sm:$0xff] (%p3725_p13), %v3738_v54 }
 0x538   : > { %v4599_v35 = vpop.f32.mrf.mxu1 }
 0x539   : > { %v3704_v36 = vadd.f32 %v4598_v34, %v6507_v40 }
 0x53a   : > { %v4600_v37 = vpop.f32.mrf.mxu1 }
 0x53b   : > { %3720 = vst [vmem:[#allocation2 + $0x38] sm:$0xff] %v3704_v36  ;;  %v4601_v38 = vadd.f32 %v4600_v37, %v4599_v35 }
 0x53c   : > { %v4602_v41 = vpop.f32.mrf.mxu1 }
 0x53d   : > { %v3705_v42 = vadd.f32 %v4601_v38, %v6507_v40 }
 0x53e   : > { %v4603_v45 = vpop.f32.mrf.mxu1  ;;  %v3740_v57 = vld [vmem:[#allocation2 + $0x10] sm:$0xff] (%p3725_p13) }
 0x53f   : > { %3721 = vst [vmem:[#allocation2 + $0x60] sm:$0xff] %v3705_v42  ;;  %v4604_v61 = vadd.f32 %v4603_v45, %v4602_v41  ;;  %3756 = vst [vmem:[#allocation16 + $0x50] sm:$0xff] (%p3725_p13), %v3740_v57 }
 0x540   : > { %v4605_v48 = vpop.f32.mrf.mxu1 }
 0x541   : > { %v3706_v49 = vadd.f32 %v4604_v61, %v6507_v40 }
 0x542   : > { %v4606_v55 = vpop.f32.mrf.mxu1  ;;  %v3741_v22 = vld [vmem:[#allocation2 + $0x38] sm:$0xff] (%p3725_p13) }
 0x543   : > { %3722 = vst [vmem:[#allocation2 + $0x70] sm:$0xff] %v3706_v49  ;;  %v4607_v56 = vadd.f32 %v4606_v55, %v4605_v48  ;;  %3757 = vst [vmem:[#allocation16 + $0x58] sm:$0xff] (%p3725_p13), %v3741_v22 }
 0x544   : > { %v4608_v0 = vpop.f32.mrf.mxu1 }
 0x545   : > { %v3707_v1 = vadd.f32 %v4607_v56, %v6507_v40 }
 0x546   : > { %v4609_v4 = vpop.f32.mrf.mxu1  ;;  %v3742_v58 = vld [vmem:[#allocation2 + $0x60] sm:$0xff] (%p3725_p13) }
 0x547   : > { %3723 = vst [vmem:[#allocation2 + $0x78] sm:$0xff] %v3707_v1  ;;  %v4610_v6 = vadd.f32 %v4609_v4, %v4608_v0  ;;  %3729 = sbr.rel (!%p3725_p13) target bundleno = 1364 (0x554), region = 112  ;;  %3758 = vst [vmem:[#allocation16 + $0x60] sm:$0xff] (%p3725_p13), %v3742_v58 }
 0x549   : > { %v3708_v62 = vadd.f32 %v4610_v6, %v6507_v40  ;;  %v3739_v40 = vld [vmem:[#allocation2 + $0x20] sm:$0xff] (%p3725_p13) }
 0x54a   : > { %3755 = vst [vmem:[#allocation16 + $0x48] sm:$0xff] (%p3725_p13), %v3739_v40  ;;  %v3743_v59 = vld [vmem:[#allocation2 + $0x70] sm:$0xff] (%p3725_p13) }
 0x54b   : > { %3724 = vst [vmem:[#allocation2 + $0x28] sm:$0xff] %v3708_v62  ;;  %3759 = vst [vmem:[#allocation16 + $0x68] sm:$0xff] (%p3725_p13), %v3743_v59 }
 0x54e   : > { %v3744_v60 = vld [vmem:[#allocation2 + $0x78] sm:$0xff] }
 0x54f   : > { %3760 = vst [vmem:[#allocation16 + $0x70] sm:$0xff] %v3744_v60 }
 0x552   : > { %v3745_v52 = vld [vmem:[#allocation2 + $0x28] sm:$0xff] }
 0x553   : > { %3761 = vst [vmem:[#allocation16 + $0x78] sm:$0xff] %v3745_v52 }
 0x554 PF: > { %p5012_p2 = scmp.eq.s32.totalorder %s5643_s0, 2  ;;  %s5484_s28 = smov [#allocation16]  }
 0x555   : > { %s3768_s3 = sshll.u32 %s5484_s28, 4  ;;  %s3769_s3 = int_to_ptr.vmem [resolvable:$true] %s3768_s3 }
 0x556   : > { %s5382_s19 = scalar_lea.vmem %s3769_s3, 2048  ;;  %p5389_p8 = scmp.lt.s32.totalorder %s3769_s3, %s3769_s3 }
 0x557   : > { %p5383_p4 = scmp.ne.s32.totalorder %s3769_s3, %s5382_s19  ;;  %p5390_p11 = scmp.lt.s32.totalorder %s5382_s19, %s5382_s19 }
 0x559   : > { %p5384_p5 = pnand %p5383_p4, %p5012_p2  ;;  %p5391_p0 = por %p5390_p11, %p5389_p8 }
 0x55b   : > { %p5385_p9 = pneg %p5384_p5 }
 0x55d   : > { %p5392_p1 = pnand %p5391_p0, %p5385_p9 }
 0x55f   : > { %5395 = shalt.err (!%p5392_p1)
}
 0x560   : > { %s5485_s15 = smov 128   ;;  %s5486_s24 = smov 8  }
 0x561   : > { %s6648_s25 = sld [smem:[#allocation34_spill]] }
 0x567   : > { %4986 = dma.vmem_to_hbm [thread:$0]  (%p5012_p2), %s3769_s3, 2048, %s6648_s25, [#allocation7], %s5485_s15, %s5485_s15, %s5486_s24  }
 0x568   : > { %5447 = dma.done.wait (%p5012_p2), [#allocation7], 2048  }
 0x569   : > { %5449 = vsyncadd (%p5012_p2), [#allocation7], 4294965248 }
 0x56a PF: > { %s34_s30 = sadd.s32 1, %s5472_s30   ;;  %s6649_s6 = sld [smem:[#allocation22_spill]] }
 0x56b   : > { %p31_p10 = scmp.ge.s32.totalorder %s34_s30, 5   ;;  %s6650_s27 = sld [smem:[#allocation24_spill]] }
 0x56c   : > { %s6651_s12 = sld [smem:[#allocation23_spill]]  ;;  %s6652_s25 = smov %s5456_s26 }
 0x56d   : > { %s6654_s28 = smov %s5468_s29 }
 0x56e   :  { %33 = sbr.rel (!%p31_p10) target bundleno = 21 (0x15), region = 197 }
 0x570   : > { %s6653_s26 = smov %s6649_s6 }
 0x572   : > { %s6655_s29 = smov %s6651_s12 }
 0x573   :  { %3784 = vsyncpa [#allocation6], 1 }
 0x574   :  { %3786 = vsyncpa [#allocation6 + $0x1], 1 }
 0x575   :  { %3787 = vsyncpa [#allocation9], 1 }
 0x576   :  { %3789 = vsyncpa [#allocation9 + $0x1], 1 }
 0x577   :  { %3790 = vsyncpa [#allocation12], 1 }
 0x578   :  { %3792 = vsyncpa [#allocation12 + $0x1], 1 }
 0x579   :  { %3793 = vsyncpa [#allocation15], 1 }
 0x57a   :  { %3795 = vsyncpa [#allocation15 + $0x1], 1 }
 0x57b   :  { %3796 = vsyncpa [#allocation7], 1 }
 0x57c   :  { %3798 = vsyncpa [#allocation7 + $0x1], 1 }

</bundles_post_ra>
